<compile_context>
chip_gen: v5e
topology: v5e:2x2
jax: 0.10.0
libtpu: 0.0.40
codegen_flags: <defaults>
</compile_context>

<pallas_src>
import math
import functools

import numpy as np
import jax
import jax.numpy as jnp
from jax.experimental import pallas as pl
from jax.experimental.pallas import tpu as pltpu


def _round_up(a, b):
    return (a + b - 1) // b * b


def _mha_kernel(x_ref, wbig_ref, bbig_ref, sseg_ref, gsum_ref, pexp_ref,
                wfold_ref, bo_ref, o_ref, *, num_heads):
    """One grid step: TM packed rows (PACK tokens per 128-lane row).

    Layout conventions (built in prepare_params):
      packed features : lane t*E + c            (token slot t, feature c)
      compact scores  : lane t*E + i*Dh + j     (query head i, key head j)
    """
    H = num_heads
    P = x_ref.shape[1]                     # packed lane width (128)

    x = x_ref[...]                                                    # (TM, P)

    # Fused projection: [q_rep_0 .. q_rep_{H-1} | k | v], all lane-dense.
    big = (jnp.dot(x, wbig_ref[...], preferred_element_type=jnp.float32)
           + bbig_ref[...])                                           # (TM, (H+2)P)
    k = big[:, H * P:(H + 1) * P]
    v = big[:, (H + 1) * P:(H + 2) * P]

    # Compact scores for ALL (query head, key head) pairs of all packed tokens.
    s = jnp.dot(big[:, 0:P] * k, sseg_ref[0],
                preferred_element_type=jnp.float32)                   # (TM, P)
    for i in range(1, H):
        s = s + jnp.dot(big[:, i * P:(i + 1) * P] * k, sseg_ref[i],
                        preferred_element_type=jnp.float32)

    # Batched softmax over the key-head groups.  The row max is uniform within
    # every group, so the softmax is exact; group sums come from one MXU matmul
    # (gsum also keeps unused lanes finite -- they never reach the output).
    m = jnp.max(s, axis=-1, keepdims=True)
    e = jnp.exp(s - m)
    denom = jnp.dot(e, gsum_ref[...], preferred_element_type=jnp.float32)
    p = e / denom                                                     # exact

    # Weighted value sum with the collapse + output projection folded into
    # wfold[i]; accumulate per query head, no concatenate, no narrow slices.
    pe = jnp.dot(p, pexp_ref[0], preferred_element_type=jnp.float32)
    acc = jnp.dot(pe * v, wfold_ref[0], preferred_element_type=jnp.float32)
    for i in range(1, H):
        pe = jnp.dot(p, pexp_ref[i], preferred_element_type=jnp.float32)
        acc = acc + jnp.dot(pe * v, wfold_ref[i],
                            preferred_element_type=jnp.float32)

    o_ref[...] = (acc + bo_ref[...]).astype(o_ref.dtype)


def prepare_params(params, num_heads):
    """Pre-build packed block-diagonal weights and mask matrices (runs once)."""
    E = int(params["wq"].shape[0])
    H = int(num_heads)
    Dh = E // H
    assert Dh * H == E, "embed_size must be divisible by num_heads"
    assert H <= Dh, "compact score layout needs num_heads**2 <= embed_size"
    if E >= 128:
        assert E % 128 == 0
        P = E
    else:
        assert 128 % E == 0
        P = 128
    PACK = P // E
    inv_scale = 1.0 / math.sqrt(Dh)

    wq = np.asarray(params["wq"], np.float32)   # torch Linear weight: (out, in)
    wk = np.asarray(params["wk"], np.float32)
    wv = np.asarray(params["wv"], np.float32)
    wo = np.asarray(params["wo"], np.float32)
    bq = np.asarray(params["bq"], np.float32)
    bk = np.asarray(params["bk"], np.float32)
    bv = np.asarray(params["bv"], np.float32)
    bo = np.asarray(params["bo"], np.float32)

    # Fused projection  x_packed @ wbig + bbig:
    #   sections 0..H-1: q_rep_i (head i's q repeated across all key-head slots,
    #                    same (t, j, d) lane layout as k / v)
    #   section  H     : k   (block-diagonal Wk)
    #   section  H+1   : v   (block-diagonal Wv)
    wbig = np.zeros((P, (H + 2) * P), np.float32)
    bbig = np.zeros((H + 2) * P, np.float32)
    for t in range(PACK):
        rows_ = slice(t * E, (t + 1) * E)
        for i in range(H):
            for j in range(H):
                for d in range(Dh):
                    col = i * P + t * E + j * Dh + d
                    wbig[rows_, col] = wq[i * Dh + d, :]
                    bbig[col] = bq[i * Dh + d]
        for c in range(E):
            wbig[rows_, H * P + t * E + c] = wk[c, :]
            bbig[H * P + t * E + c] = bk[c]
            wbig[rows_, (H + 1) * P + t * E + c] = wv[c, :]
            bbig[(H + 1) * P + t * E + c] = bv[c]

    # sseg[i]: (q_rep_i * k) -> compact scores (segment-sum over d, * 1/sqrt(Dh)).
    sseg = np.zeros((H, P, P), np.float32)
    for i in range(H):
        for t in range(PACK):
            for j in range(H):
                for d in range(Dh):
                    sseg[i, t * E + j * Dh + d, t * E + i * Dh + j] = inv_scale

    # gsum: exp(scores) -> softmax denominator broadcast over each (t, i) group
    # of H lanes; identity on unused lanes keeps them finite (they never reach
    # the output because pexp has zero rows for them).
    gsum = np.zeros((P, P), np.float32)
    used = np.zeros(P, bool)
    for t in range(PACK):
        for i in range(H):
            for j in range(H):
                used[t * E + i * Dh + j] = True
                for j2 in range(H):
                    gsum[t * E + i * Dh + j, t * E + i * Dh + j2] = 1.0
    for l in range(P):
        if not used[l]:
            gsum[l, l] = 1.0

    # pexp[i]: compact probs -> probs(t, i, j) repeated over key head j's Dh
    # lanes (same layout as v).
    pexp = np.zeros((H, P, P), np.float32)
    for i in range(H):
        for t in range(PACK):
            for j in range(H):
                for d in range(Dh):
                    pexp[i, t * E + i * Dh + j, t * E + j * Dh + d] = 1.0

    # wfold[i]: (probs_exp_i * v) -> output; the per-head collapse is folded
    # into the output projection: wfold[i][t*E + j*Dh + d, t*E + c] = Wo[c, i*Dh + d].
    wfold = np.zeros((H, P, P), np.float32)
    for i in range(H):
        for t in range(PACK):
            for j in range(H):
                for d in range(Dh):
                    wfold[i, t * E + j * Dh + d, t * E:(t + 1) * E] = wo[:, i * Dh + d]

    bop = np.tile(bo, PACK).reshape(1, P)

    return {
        "wbig": jnp.asarray(wbig),
        "bbig": jnp.asarray(bbig.reshape(1, -1)),
        "sseg": jnp.asarray(sseg),
        "gsum": jnp.asarray(gsum),
        "pexp": jnp.asarray(pexp),
        "wfold": jnp.asarray(wfold),
        "bo": jnp.asarray(bop),
        "num_heads": H,
        "embed": E,
        "packed_width": P,
    }


def multi_head_attention(x, prep, *, tile_tokens=4096):
    """x: (B, S, E) float32.  prep: output of prepare_params()."""
    B, S, E = x.shape
    assert E == prep["embed"]
    H = prep["num_heads"]
    P = prep["packed_width"]
    PACK = P // E
    M = B * S

    # Tile selection: big tiles amortize the ~0.35us/step overhead, but keep
    # >= 2 grid steps when there is enough work so the "parallel" grid axis can
    # be sharded across both TensorCores on v7x.
    rows = _round_up(max(pl.cdiv(M, PACK), 8), 8)
    max_tile_rows = _round_up(max(tile_tokens // PACK, 8), 8)
    num_tiles = pl.cdiv(rows, max_tile_rows)
    if num_tiles == 1 and rows > 8:
        num_tiles = 2
    tile_rows = _round_up(pl.cdiv(rows, num_tiles), 8)
    num_tiles = pl.cdiv(rows, tile_rows)
    rows = num_tiles * tile_rows
    M_pad = rows * PACK

    x2d = x.reshape(M, E).astype(jnp.float32)
    if M_pad != M:
        x2d = jnp.pad(x2d, ((0, M_pad - M), (0, 0)))
    xp = x2d.reshape(rows, P)                      # 4 tokens per 128-lane row

    kernel = functools.partial(_mha_kernel, num_heads=H)
    const2 = lambda i: (0, 0)                      # VMEM-resident across grid
    const3 = lambda i: (0, 0, 0)

    out_packed = pl.pallas_call(
        kernel,
        out_shape=jax.ShapeDtypeStruct((rows, P), jnp.float32),
        grid_spec=pltpu.PrefetchScalarGridSpec(
            num_scalar_prefetch=0,
            grid=(num_tiles,),
            in_specs=[
                pl.BlockSpec((tile_rows, P), lambda i: (i, 0)),
                pl.BlockSpec(prep["wbig"].shape, const2),
                pl.BlockSpec(prep["bbig"].shape, const2),
                pl.BlockSpec(prep["sseg"].shape, const3),
                pl.BlockSpec(prep["gsum"].shape, const2),
                pl.BlockSpec(prep["pexp"].shape, const3),
                pl.BlockSpec(prep["wfold"].shape, const3),
                pl.BlockSpec(prep["bo"].shape, const2),
            ],
            out_specs=pl.BlockSpec((tile_rows, P), lambda i: (i, 0)),
        ),
        compiler_params=pltpu.CompilerParams(
            dimension_semantics=("parallel",),
            vmem_limit_bytes=32 * 1024 * 1024,
        ),
    )(xp, prep["wbig"], prep["bbig"], prep["sseg"], prep["gsum"],
      prep["pexp"], prep["wfold"], prep["bo"])

    return out_packed.reshape(M_pad, E)[:M].reshape(B, S, E)


def multi_head_attention_ref(x, params, num_heads):
    """Plain-JAX reference reproducing the PyTorch forward semantics."""
    B, S, E = x.shape
    Dh = E // num_heads
    scale = Dh ** 0.5

    def lin(inp, w, b):
        return inp @ jnp.asarray(w).T + jnp.asarray(b)

    Q = lin(x, params["wq"], params["bq"]).reshape(B, S, num_heads, Dh)
    K = lin(x, params["wk"], params["bk"]).reshape(B, S, num_heads, Dh)
    V = lin(x, params["wv"], params["bv"]).reshape(B, S, num_heads, Dh)
    scores = jnp.einsum("bsid,bsjd->bsij", Q, K) / scale     # (B, S, H, H)
    probs = jax.nn.softmax(scores, axis=-1)
    attn = jnp.einsum("bsij,bsjd->bsid", probs, V).reshape(B, S, E)
    return lin(attn, params["wo"], params["bo"])


def init_params(key, embed_size):
    ks = jax.random.split(key, 8)
    s = 1.0 / math.sqrt(embed_size)
    return {
        "wq": jax.random.uniform(ks[0], (embed_size, embed_size), jnp.float32, -s, s),
        "bq": jax.random.uniform(ks[1], (embed_size,), jnp.float32, -s, s),
        "wk": jax.random.uniform(ks[2], (embed_size, embed_size), jnp.float32, -s, s),
        "bk": jax.random.uniform(ks[3], (embed_size,), jnp.float32, -s, s),
        "wv": jax.random.uniform(ks[4], (embed_size, embed_size), jnp.float32, -s, s),
        "bv": jax.random.uniform(ks[5], (embed_size,), jnp.float32, -s, s),
        "wo": jax.random.uniform(ks[6], (embed_size, embed_size), jnp.float32, -s, s),
        "bo": jax.random.uniform(ks[7], (embed_size,), jnp.float32, -s, s),
    }


if __name__ == "__main__":
    B, S, E, H = 2, 8, 32, 4   # embed_size=32, num_heads=4 -> head_dim=8
    key = jax.random.PRNGKey(0)
    kx, kp = jax.random.split(key)
    x = jax.random.normal(kx, (B, S, E), jnp.float32)
    params = init_params(kp, E)
    prep = prepare_params(params, H)

    out = multi_head_attention(x, prep)
    out = jax.block_until_ready(out)

    ref = multi_head_attention_ref(x, params, H)
    assert out.shape == (B, S, E)
    err = jnp.max(jnp.abs(out - ref))
    assert jnp.allclose(out, ref, rtol=1e-2, atol=1e-2), f"max abs err {err}"
    print("KERNEL_OK")
</pallas_src>

<mosaic_0001>
module attributes {stable_mosaic.version = 11 : i64} {
  func.func @_mha_kernel(%arg0: i32, %arg1: memref<8x128xf32, #tpu.memory_space<vmem>>, %arg2: memref<128x768xf32, #tpu.memory_space<vmem>>, %arg3: memref<1x768xf32, #tpu.memory_space<vmem>>, %arg4: memref<4x128x128xf32, #tpu.memory_space<vmem>>, %arg5: memref<128x128xf32, #tpu.memory_space<vmem>>, %arg6: memref<4x128x128xf32, #tpu.memory_space<vmem>>, %arg7: memref<4x128x128xf32, #tpu.memory_space<vmem>>, %arg8: memref<1x128xf32, #tpu.memory_space<vmem>>, %arg9: memref<8x128xf32, #tpu.memory_space<vmem>>) attributes {dimension_semantics = [#tpu.dimension_semantics<parallel>], iteration_bounds = array<i64: 1>, scalar_prefetch = 0 : i64, scratch_operands = 0 : i64, tpu.core_type = #tpu.core_type<tc>, window_params = [{transform_indices = @transform_0, window_bounds = array<i64: 8, 128>}, {pipeline_mode = #tpu.pipeline_mode<synchronous>, transform_indices = @transform_1, window_bounds = array<i64: 128, 768>}, {pipeline_mode = #tpu.pipeline_mode<synchronous>, transform_indices = @transform_2, window_bounds = array<i64: 1, 768>}, {pipeline_mode = #tpu.pipeline_mode<synchronous>, transform_indices = @transform_3, window_bounds = array<i64: 4, 128, 128>}, {pipeline_mode = #tpu.pipeline_mode<synchronous>, transform_indices = @transform_4, window_bounds = array<i64: 128, 128>}, {pipeline_mode = #tpu.pipeline_mode<synchronous>, transform_indices = @transform_5, window_bounds = array<i64: 4, 128, 128>}, {pipeline_mode = #tpu.pipeline_mode<synchronous>, transform_indices = @transform_6, window_bounds = array<i64: 4, 128, 128>}, {pipeline_mode = #tpu.pipeline_mode<synchronous>, transform_indices = @transform_7, window_bounds = array<i64: 1, 128>}, {transform_indices = @transform_8, window_bounds = array<i64: 8, 128>}]} {
    %c0 = arith.constant 0 : index
    %c0_0 = arith.constant 0 : index
    %0 = vector.load %arg1[%c0, %c0_0] : memref<8x128xf32, #tpu.memory_space<vmem>>, vector<8x128xf32>
    %c0_1 = arith.constant 0 : index
    %c0_2 = arith.constant 0 : index
    %1 = vector.load %arg2[%c0_1, %c0_2] : memref<128x768xf32, #tpu.memory_space<vmem>>, vector<128x768xf32>
    %cst = arith.constant dense<0.000000e+00> : vector<8x768xf32>
    %2 = tpu.matmul %0, %1, %cst {dimension_numbers = #tpu.dot_dimension_numbers<[1], [0], [0], [1], [0, 0, 1, 1], [], []>} : vector<8x128xf32>, vector<128x768xf32>, vector<8x768xf32> -> vector<8x768xf32>
    %c0_3 = arith.constant 0 : index
    %c0_4 = arith.constant 0 : index
    %3 = vector.load %arg3[%c0_3, %c0_4] : memref<1x768xf32, #tpu.memory_space<vmem>>, vector<1x768xf32>
    %4 = vector.broadcast %3 : vector<1x768xf32> to vector<8x768xf32>
    %5 = arith.addf %2, %4 : vector<8x768xf32>
    %6 = vector.extract_strided_slice %5 {offsets = [0, 512], sizes = [8, 128], strides = [1, 1]} : vector<8x768xf32> to vector<8x128xf32>
    %7 = vector.extract_strided_slice %5 {offsets = [0, 640], sizes = [8, 128], strides = [1, 1]} : vector<8x768xf32> to vector<8x128xf32>
    %8 = vector.extract_strided_slice %5 {offsets = [0, 0], sizes = [8, 128], strides = [1, 1]} : vector<8x768xf32> to vector<8x128xf32>
    %9 = arith.mulf %8, %6 : vector<8x128xf32>
    %c0_5 = arith.constant 0 : index
    %c0_6 = arith.constant 0 : index
    %c0_7 = arith.constant 0 : index
    %10 = vector.load %arg4[%c0_5, %c0_6, %c0_7] : memref<4x128x128xf32, #tpu.memory_space<vmem>>, vector<1x128x128xf32>
    %11 = vector.shape_cast %10 : vector<1x128x128xf32> to vector<128x128xf32>
    %cst_8 = arith.constant dense<0.000000e+00> : vector<8x128xf32>
    %12 = tpu.matmul %9, %11, %cst_8 {dimension_numbers = #tpu.dot_dimension_numbers<[1], [0], [0], [1], [0, 0, 1, 1], [], []>} : vector<8x128xf32>, vector<128x128xf32>, vector<8x128xf32> -> vector<8x128xf32>
    %13 = vector.extract_strided_slice %5 {offsets = [0, 128], sizes = [8, 128], strides = [1, 1]} : vector<8x768xf32> to vector<8x128xf32>
    %14 = arith.mulf %13, %6 : vector<8x128xf32>
    %c1 = arith.constant 1 : index
    %c0_9 = arith.constant 0 : index
    %c0_10 = arith.constant 0 : index
    %15 = vector.load %arg4[%c1, %c0_9, %c0_10] : memref<4x128x128xf32, #tpu.memory_space<vmem>>, vector<1x128x128xf32>
    %16 = vector.shape_cast %15 : vector<1x128x128xf32> to vector<128x128xf32>
    %cst_11 = arith.constant dense<0.000000e+00> : vector<8x128xf32>
    %17 = tpu.matmul %14, %16, %cst_11 {dimension_numbers = #tpu.dot_dimension_numbers<[1], [0], [0], [1], [0, 0, 1, 1], [], []>} : vector<8x128xf32>, vector<128x128xf32>, vector<8x128xf32> -> vector<8x128xf32>
    %18 = arith.addf %12, %17 : vector<8x128xf32>
    %19 = vector.extract_strided_slice %5 {offsets = [0, 256], sizes = [8, 128], strides = [1, 1]} : vector<8x768xf32> to vector<8x128xf32>
    %20 = arith.mulf %19, %6 : vector<8x128xf32>
    %c2 = arith.constant 2 : index
    %c0_12 = arith.constant 0 : index
    %c0_13 = arith.constant 0 : index
    %21 = vector.load %arg4[%c2, %c0_12, %c0_13] : memref<4x128x128xf32, #tpu.memory_space<vmem>>, vector<1x128x128xf32>
    %22 = vector.shape_cast %21 : vector<1x128x128xf32> to vector<128x128xf32>
    %cst_14 = arith.constant dense<0.000000e+00> : vector<8x128xf32>
    %23 = tpu.matmul %20, %22, %cst_14 {dimension_numbers = #tpu.dot_dimension_numbers<[1], [0], [0], [1], [0, 0, 1, 1], [], []>} : vector<8x128xf32>, vector<128x128xf32>, vector<8x128xf32> -> vector<8x128xf32>
    %24 = arith.addf %18, %23 : vector<8x128xf32>
    %25 = vector.extract_strided_slice %5 {offsets = [0, 384], sizes = [8, 128], strides = [1, 1]} : vector<8x768xf32> to vector<8x128xf32>
    %26 = arith.mulf %25, %6 : vector<8x128xf32>
    %c3 = arith.constant 3 : index
    %c0_15 = arith.constant 0 : index
    %c0_16 = arith.constant 0 : index
    %27 = vector.load %arg4[%c3, %c0_15, %c0_16] : memref<4x128x128xf32, #tpu.memory_space<vmem>>, vector<1x128x128xf32>
    %28 = vector.shape_cast %27 : vector<1x128x128xf32> to vector<128x128xf32>
    %cst_17 = arith.constant dense<0.000000e+00> : vector<8x128xf32>
    %29 = tpu.matmul %26, %28, %cst_17 {dimension_numbers = #tpu.dot_dimension_numbers<[1], [0], [0], [1], [0, 0, 1, 1], [], []>} : vector<8x128xf32>, vector<128x128xf32>, vector<8x128xf32> -> vector<8x128xf32>
    %30 = arith.addf %24, %29 : vector<8x128xf32>
    %cst_18 = arith.constant dense<0xFF800000> : vector<8xf32>
    %31 = vector.multi_reduction <maximumf>, %30, %cst_18 [1] : vector<8x128xf32> to vector<8xf32>
    %32 = vector.shape_cast %31 : vector<8xf32> to vector<8x1xf32>
    %33 = vector.broadcast %32 : vector<8x1xf32> to vector<8x128xf32>
    %34 = arith.subf %30, %33 : vector<8x128xf32>
    %35 = math.exp %34 : vector<8x128xf32>
    %c0_19 = arith.constant 0 : index
    %c0_20 = arith.constant 0 : index
    %36 = vector.load %arg5[%c0_19, %c0_20] : memref<128x128xf32, #tpu.memory_space<vmem>>, vector<128x128xf32>
    %cst_21 = arith.constant dense<0.000000e+00> : vector<8x128xf32>
    %37 = tpu.matmul %35, %36, %cst_21 {dimension_numbers = #tpu.dot_dimension_numbers<[1], [0], [0], [1], [0, 0, 1, 1], [], []>} : vector<8x128xf32>, vector<128x128xf32>, vector<8x128xf32> -> vector<8x128xf32>
    %38 = arith.divf %35, %37 : vector<8x128xf32>
    %c0_22 = arith.constant 0 : index
    %c0_23 = arith.constant 0 : index
    %c0_24 = arith.constant 0 : index
    %39 = vector.load %arg6[%c0_22, %c0_23, %c0_24] : memref<4x128x128xf32, #tpu.memory_space<vmem>>, vector<1x128x128xf32>
    %40 = vector.shape_cast %39 : vector<1x128x128xf32> to vector<128x128xf32>
    %cst_25 = arith.constant dense<0.000000e+00> : vector<8x128xf32>
    %41 = tpu.matmul %38, %40, %cst_25 {dimension_numbers = #tpu.dot_dimension_numbers<[1], [0], [0], [1], [0, 0, 1, 1], [], []>} : vector<8x128xf32>, vector<128x128xf32>, vector<8x128xf32> -> vector<8x128xf32>
    %42 = arith.mulf %41, %7 : vector<8x128xf32>
    %c0_26 = arith.constant 0 : index
    %c0_27 = arith.constant 0 : index
    %c0_28 = arith.constant 0 : index
    %43 = vector.load %arg7[%c0_26, %c0_27, %c0_28] : memref<4x128x128xf32, #tpu.memory_space<vmem>>, vector<1x128x128xf32>
    %44 = vector.shape_cast %43 : vector<1x128x128xf32> to vector<128x128xf32>
    %cst_29 = arith.constant dense<0.000000e+00> : vector<8x128xf32>
    %45 = tpu.matmul %42, %44, %cst_29 {dimension_numbers = #tpu.dot_dimension_numbers<[1], [0], [0], [1], [0, 0, 1, 1], [], []>} : vector<8x128xf32>, vector<128x128xf32>, vector<8x128xf32> -> vector<8x128xf32>
    %c1_30 = arith.constant 1 : index
    %c0_31 = arith.constant 0 : index
    %c0_32 = arith.constant 0 : index
    %46 = vector.load %arg6[%c1_30, %c0_31, %c0_32] : memref<4x128x128xf32, #tpu.memory_space<vmem>>, vector<1x128x128xf32>
    %47 = vector.shape_cast %46 : vector<1x128x128xf32> to vector<128x128xf32>
    %cst_33 = arith.constant dense<0.000000e+00> : vector<8x128xf32>
    %48 = tpu.matmul %38, %47, %cst_33 {dimension_numbers = #tpu.dot_dimension_numbers<[1], [0], [0], [1], [0, 0, 1, 1], [], []>} : vector<8x128xf32>, vector<128x128xf32>, vector<8x128xf32> -> vector<8x128xf32>
    %49 = arith.mulf %48, %7 : vector<8x128xf32>
    %c1_34 = arith.constant 1 : index
    %c0_35 = arith.constant 0 : index
    %c0_36 = arith.constant 0 : index
    %50 = vector.load %arg7[%c1_34, %c0_35, %c0_36] : memref<4x128x128xf32, #tpu.memory_space<vmem>>, vector<1x128x128xf32>
    %51 = vector.shape_cast %50 : vector<1x128x128xf32> to vector<128x128xf32>
    %cst_37 = arith.constant dense<0.000000e+00> : vector<8x128xf32>
    %52 = tpu.matmul %49, %51, %cst_37 {dimension_numbers = #tpu.dot_dimension_numbers<[1], [0], [0], [1], [0, 0, 1, 1], [], []>} : vector<8x128xf32>, vector<128x128xf32>, vector<8x128xf32> -> vector<8x128xf32>
    %53 = arith.addf %45, %52 : vector<8x128xf32>
    %c2_38 = arith.constant 2 : index
    %c0_39 = arith.constant 0 : index
    %c0_40 = arith.constant 0 : index
    %54 = vector.load %arg6[%c2_38, %c0_39, %c0_40] : memref<4x128x128xf32, #tpu.memory_space<vmem>>, vector<1x128x128xf32>
    %55 = vector.shape_cast %54 : vector<1x128x128xf32> to vector<128x128xf32>
    %cst_41 = arith.constant dense<0.000000e+00> : vector<8x128xf32>
    %56 = tpu.matmul %38, %55, %cst_41 {dimension_numbers = #tpu.dot_dimension_numbers<[1], [0], [0], [1], [0, 0, 1, 1], [], []>} : vector<8x128xf32>, vector<128x128xf32>, vector<8x128xf32> -> vector<8x128xf32>
    %57 = arith.mulf %56, %7 : vector<8x128xf32>
    %c2_42 = arith.constant 2 : index
    %c0_43 = arith.constant 0 : index
    %c0_44 = arith.constant 0 : index
    %58 = vector.load %arg7[%c2_42, %c0_43, %c0_44] : memref<4x128x128xf32, #tpu.memory_space<vmem>>, vector<1x128x128xf32>
    %59 = vector.shape_cast %58 : vector<1x128x128xf32> to vector<128x128xf32>
    %cst_45 = arith.constant dense<0.000000e+00> : vector<8x128xf32>
    %60 = tpu.matmul %57, %59, %cst_45 {dimension_numbers = #tpu.dot_dimension_numbers<[1], [0], [0], [1], [0, 0, 1, 1], [], []>} : vector<8x128xf32>, vector<128x128xf32>, vector<8x128xf32> -> vector<8x128xf32>
    %61 = arith.addf %53, %60 : vector<8x128xf32>
    %c3_46 = arith.constant 3 : index
    %c0_47 = arith.constant 0 : index
    %c0_48 = arith.constant 0 : index
    %62 = vector.load %arg6[%c3_46, %c0_47, %c0_48] : memref<4x128x128xf32, #tpu.memory_space<vmem>>, vector<1x128x128xf32>
    %63 = vector.shape_cast %62 : vector<1x128x128xf32> to vector<128x128xf32>
    %cst_49 = arith.constant dense<0.000000e+00> : vector<8x128xf32>
    %64 = tpu.matmul %38, %63, %cst_49 {dimension_numbers = #tpu.dot_dimension_numbers<[1], [0], [0], [1], [0, 0, 1, 1], [], []>} : vector<8x128xf32>, vector<128x128xf32>, vector<8x128xf32> -> vector<8x128xf32>
    %65 = arith.mulf %64, %7 : vector<8x128xf32>
    %c3_50 = arith.constant 3 : index
    %c0_51 = arith.constant 0 : index
    %c0_52 = arith.constant 0 : index
    %66 = vector.load %arg7[%c3_50, %c0_51, %c0_52] : memref<4x128x128xf32, #tpu.memory_space<vmem>>, vector<1x128x128xf32>
    %67 = vector.shape_cast %66 : vector<1x128x128xf32> to vector<128x128xf32>
    %cst_53 = arith.constant dense<0.000000e+00> : vector<8x128xf32>
    %68 = tpu.matmul %65, %67, %cst_53 {dimension_numbers = #tpu.dot_dimension_numbers<[1], [0], [0], [1], [0, 0, 1, 1], [], []>} : vector<8x128xf32>, vector<128x128xf32>, vector<8x128xf32> -> vector<8x128xf32>
    %69 = arith.addf %61, %68 : vector<8x128xf32>
    %c0_54 = arith.constant 0 : index
    %c0_55 = arith.constant 0 : index
    %70 = vector.load %arg8[%c0_54, %c0_55] : memref<1x128xf32, #tpu.memory_space<vmem>>, vector<1x128xf32>
    %71 = vector.broadcast %70 : vector<1x128xf32> to vector<8x128xf32>
    %72 = arith.addf %69, %71 : vector<8x128xf32>
    %c0_56 = arith.constant 0 : index
    %c0_57 = arith.constant 0 : index
    %73 = vector.load %arg9[%c0_56, %c0_57] : memref<8x128xf32, #tpu.memory_space<vmem>>, vector<8x128xf32>
    tpu.vector_store %arg9[%c0_56, %c0_57], %72 {strides = array<i32>} : memref<8x128xf32, #tpu.memory_space<vmem>>, vector<8x128xf32>,
    return
  }
  func.func @transform_0(%arg0: i32) -> (i32, i32) {
    %c0_i32 = arith.constant 0 : i32
    %c0_i32_0 = arith.constant 0 : i32
    return %arg0, %c0_i32 : i32, i32
  }
  func.func @transform_1(%arg0: i32) -> (i32, i32) {
    %c0_i32 = arith.constant 0 : i32
    %c0_i32_0 = arith.constant 0 : i32
    %c0_i32_1 = arith.constant 0 : i32
    return %c0_i32, %c0_i32_0 : i32, i32
  }
  func.func @transform_2(%arg0: i32) -> (i32, i32) {
    %c0_i32 = arith.constant 0 : i32
    %c0_i32_0 = arith.constant 0 : i32
    %c0_i32_1 = arith.constant 0 : i32
    return %c0_i32, %c0_i32_0 : i32, i32
  }
  func.func @transform_3(%arg0: i32) -> (i32, i32, i32) {
    %c0_i32 = arith.constant 0 : i32
    %c0_i32_0 = arith.constant 0 : i32
    %c0_i32_1 = arith.constant 0 : i32
    %c0_i32_2 = arith.constant 0 : i32
    return %c0_i32, %c0_i32_0, %c0_i32_1 : i32, i32, i32
  }
  func.func @transform_4(%arg0: i32) -> (i32, i32) {
    %c0_i32 = arith.constant 0 : i32
    %c0_i32_0 = arith.constant 0 : i32
    %c0_i32_1 = arith.constant 0 : i32
    return %c0_i32, %c0_i32_0 : i32, i32
  }
  func.func @transform_5(%arg0: i32) -> (i32, i32, i32) {
    %c0_i32 = arith.constant 0 : i32
    %c0_i32_0 = arith.constant 0 : i32
    %c0_i32_1 = arith.constant 0 : i32
    %c0_i32_2 = arith.constant 0 : i32
    return %c0_i32, %c0_i32_0, %c0_i32_1 : i32, i32, i32
  }
  func.func @transform_6(%arg0: i32) -> (i32, i32, i32) {
    %c0_i32 = arith.constant 0 : i32
    %c0_i32_0 = arith.constant 0 : i32
    %c0_i32_1 = arith.constant 0 : i32
    %c0_i32_2 = arith.constant 0 : i32
    return %c0_i32, %c0_i32_0, %c0_i32_1 : i32, i32, i32
  }
  func.func @transform_7(%arg0: i32) -> (i32, i32) {
    %c0_i32 = arith.constant 0 : i32
    %c0_i32_0 = arith.constant 0 : i32
    %c0_i32_1 = arith.constant 0 : i32
    return %c0_i32, %c0_i32_0 : i32, i32
  }
  func.func @transform_8(%arg0: i32) -> (i32, i32) {
    %c0_i32 = arith.constant 0 : i32
    %c0_i32_0 = arith.constant 0 : i32
    return %arg0, %c0_i32 : i32, i32
  }
}

</mosaic_0001>

<bundles_post_ra>
// kernel: tpu_custom_call.1
= control target key start
LH: loop header
LB: loop body
LE: loop exit
PB: predicated region body
PF: predicated region fallthrough
CT: control target
= control target key end

     0   :  { %13 = vsyncpa [#allocation3], 0  ;;  %s1245_s0 = inlined_call_operand.hbm [shape: f32[8,128], index: 0, kind: input, shape index: {}]   ;;  %s1246_s1 = inlined_call_operand.hbm [shape: f32[128,768], index: 1, kind: input, shape index: {}]   ;;  %s1247_s2 = inlined_call_operand.hbm [shape: f32[1,768], index: 2, kind: input, shape index: {}]   ;;  %s1248_s3 = inlined_call_operand.hbm [shape: f32[4,128,128], index: 3, kind: input, shape index: {}]   ;;  %s1249_s4 = inlined_call_operand.hbm [shape: f32[128,128], index: 4, kind: input, shape index: {}]   ;;  %s1250_s5 = inlined_call_operand.hbm [shape: f32[4,128,128], index: 5, kind: input, shape index: {}]   ;;  %s1251_s6 = inlined_call_operand.hbm [shape: f32[4,128,128], index: 6, kind: input, shape index: {}]   ;;  %s1252_s7 = inlined_call_operand.vmem [shape: f32[1,128], index: 7, kind: input, shape index: {}]   ;;  %s1253_s8 = inlined_call_operand.hbm [shape: f32[8,128], index: 8, kind: output, shape index: {}]  }
   0x1   :  { %14 = vsyncpa [#allocation6], 0 }
   0x2   :  { %15 = vsyncpa [#allocation9], 0 }
   0x3   :  { %16 = vsyncpa [#allocation12], 0  ;;  %s33_s29 = sshll.u32 %s1246_s1, 4  ;;  %s34_s29 = int_to_ptr.hbm [resolvable:$true] %s33_s29 }
   0x4   :  { %17 = vsyncpa [#allocation4], 0  ;;  %s1120_s30 = smov [#allocation5]   ;;  %s57_s12 = sshll.u32 %s1248_s3, 4  ;;  %s58_s12 = int_to_ptr.hbm [resolvable:$true] %s57_s12 }
   0x5   :  { %s35_s9 = sshll.u32 %s1120_s30, 4  ;;  %s1121_s13 = smov 768   ;;  %s36_s9 = int_to_ptr.vmem [resolvable:$true] %s35_s9 }
   0x6   :  { %s1122_s14 = smov 48   ;;  %s1123_s15 = smov [#allocation8]  }
   0x7   :  { %41 = dma.hbm_to_vmem [thread:$0]  %s34_s29, 12288, %s36_s9, [#allocation6], %s1121_s13, %s1121_s13, %s1122_s14  }
   0x8   :  { %s59_s16 = sshll.u32 %s1123_s15, 4  ;;  %s1124_s17 = smov 128   ;;  %s60_s16 = int_to_ptr.vmem [resolvable:$true] %s59_s16 }
   0x9   :  { %s1125_s18 = smov 8   ;;  %s83_s20 = sshll.u32 %s1250_s5, 4  ;;  %s84_s20 = int_to_ptr.hbm [resolvable:$true] %s83_s20 }
   0xa   :  { %65 = dma.hbm_to_vmem [thread:$0]  %s58_s12, 8192, %s60_s16, [#allocation9], %s1124_s17, %s1124_s17, %s1125_s18  }
   0xb   :  { %s1126_s21 = smov [#allocation11]   ;;  %s23_s24 = sshll.u32 %s1245_s0, 4  ;;  %s24_s24 = int_to_ptr.hbm [resolvable:$true] %s23_s24 }
   0xc   :  { %s85_s3 = sshll.u32 %s1126_s21, 4  ;;  %s1127_s25 = smov [#allocation2]   ;;  %s86_s3 = int_to_ptr.vmem [resolvable:$true] %s85_s3 }
   0xd   :  { %91 = dma.hbm_to_vmem [thread:$0]  %s84_s20, 8192, %s86_s3, [#allocation12], %s1124_s17, %s1124_s17, %s1125_s18  }
   0xe   :  { %s25_s26 = sshll.u32 %s1127_s25, 4  ;;  %s47_s29 = sshll.u32 %s1247_s2, 4  ;;  %s26_s26 = int_to_ptr.vmem [resolvable:$true] %s25_s26  ;;  %s48_s29 = int_to_ptr.hbm [resolvable:$true] %s47_s29 }
   0xf   :  { %28 = dma.hbm_to_vmem [thread:$0]  %s24_s24, 128, %s26_s26, [#allocation3]  }
  0x10   :  { %s70_s9 = sshll.u32 %s1249_s4, 4  ;;  %s1128_s10 = smov [#allocation7]   ;;  %s71_s9 = int_to_ptr.hbm [resolvable:$true] %s70_s9 }
  0x11   :  { %s49_s0 = sshll.u32 %s1128_s10, 4  ;;  %s1129_s11 = smov [#allocation10]   ;;  %s50_s0 = int_to_ptr.vmem [resolvable:$true] %s49_s0 }
  0x12   :  { %52 = dma.hbm_to_vmem [thread:$0]  %s48_s29, 96, %s50_s0, [#allocation6]  }
  0x13   :  { %s72_s12 = sshll.u32 %s1129_s11, 4  ;;  %s96_s15 = sshll.u32 %s1251_s6, 4  ;;  %s73_s12 = int_to_ptr.vmem [resolvable:$true] %s72_s12  ;;  %s97_s15 = int_to_ptr.hbm [resolvable:$true] %s96_s15 }
  0x14   :  { %78 = dma.hbm_to_vmem [thread:$0]  %s71_s9, 2048, %s73_s12, [#allocation9], %s1124_s17, %s1124_s17, %s1125_s18  }
  0x15   :  { %s1130_s2 = smov [#allocation13]  }
  0x16   :  { %s98_s16 = sshll.u32 %s1130_s2, 4  ;;  %s99_s16 = int_to_ptr.vmem [resolvable:$true] %s98_s16 }
  0x17   :  { %104 = dma.hbm_to_vmem [thread:$0]  %s97_s15, 8192, %s99_s16, [#allocation12], %s1124_s17, %s1124_s17, %s1125_s18  }
  0x18   :  { %1110 = dma.done.wait [#allocation3], 128  }
  0x19   :  { %1111 = vsyncadd [#allocation3], 4294967168 }
  0x1a   :  { %1112 = dma.done.wait [#allocation6], 12384  }
  0x1b   :  { %1113 = vsyncadd [#allocation6], 4294954912 }
  0x1c   :  { %1114 = dma.done.wait [#allocation9], 10240  }
  0x1d   :  { %1115 = vsyncadd [#allocation9], 4294957056 }
  0x1e   :  { %1116 = dma.done.wait [#allocation12], 16384  }
  0x1f   :  { %1117 = vsyncadd [#allocation12], 4294950912  ;;  %v226_v0 = vld [vmem:[#allocation5 + $0x2d0] sm:$0xff]  ;;  %v220_v1 = vld [vmem:[#allocation5 + $0x2a0] sm:$0xff]  ;;  %s1131_s17 = smov [#allocation14]   ;;  %s888_s20 = sshll.u32 %s1253_s8, 4  ;;  %s889_s20 = int_to_ptr.hbm [resolvable:$true] %s888_s20 }
  0x20   :  { %246 = vmatpush.msra.mxu0 %v226_v0  ;;  %v214_v2 = vld [vmem:[#allocation5 + $0x270] sm:$0xff]  ;;  %v208_v3 = vld [vmem:[#allocation5 + $0x240] sm:$0xff]  ;;  %v229_v5 = vld [vmem:[#allocation5 + $0x2e8] sm:$0xff]  ;;  %s886_s18 = sshll.u32 %s1131_s17, 4  ;;  %s887_s18 = int_to_ptr.vmem [resolvable:$true] %s886_s18 }
  0x21   :  { %v228_v4 = vld [vmem:[#allocation5 + $0x2e0] sm:$0xff]  ;;  %v222_v6 = vld [vmem:[#allocation5 + $0x2b0] sm:$0xff]  ;;  %v223_v7 = vld [vmem:[#allocation5 + $0x2b8] sm:$0xff]  ;;  %306 = vmatpush.msra.mxu3 %v229_v5 }
  0x22   :  { %247 = vmatpush.msra.mxu0 %v220_v1  ;;  %286 = vmatpush.msra.mxu2 %v228_v4  ;;  %v202_v8 = vld [vmem:[#allocation5 + $0x210] sm:$0xff]  ;;  %v216_v9 = vld [vmem:[#allocation5 + $0x280] sm:$0xff]  ;;  %v217_v10 = vld [vmem:[#allocation5 + $0x288] sm:$0xff] }
  0x23   :  { %v227_v11 = vld [vmem:[#allocation5 + $0x2d8] sm:$0xff]  ;;  %v196_v12 = vld [vmem:[#allocation5 + $0x1e0] sm:$0xff]  ;;  %307 = vmatpush.msra.mxu3 %v223_v7  ;;  %v210_v13 = vld [vmem:[#allocation5 + $0x250] sm:$0xff] }
  0x24   :  { %248 = vmatpush.msra.mxu0 %v214_v2  ;;  %287 = vmatpush.msra.mxu2 %v222_v6  ;;  %v221_v14 = vld [vmem:[#allocation5 + $0x2a8] sm:$0xff]  ;;  %v211_v15 = vld [vmem:[#allocation5 + $0x258] sm:$0xff]  ;;  %v190_v16 = vld [vmem:[#allocation5 + $0x1b0] sm:$0xff] }
  0x25   :  { %266 = vmatpush.msra.mxu1 %v227_v11  ;;  %308 = vmatpush.msra.mxu3 %v217_v10  ;;  %v204_v17 = vld [vmem:[#allocation5 + $0x220] sm:$0xff]  ;;  %v215_v18 = vld [vmem:[#allocation5 + $0x278] sm:$0xff]  ;;  %v205_v19 = vld [vmem:[#allocation5 + $0x228] sm:$0xff] }
  0x26   :  { %249 = vmatpush.msra.mxu0 %v208_v3  ;;  %288 = vmatpush.msra.mxu2 %v216_v9  ;;  %v209_v20 = vld [vmem:[#allocation5 + $0x248] sm:$0xff]  ;;  %v184_v21 = vld [vmem:[#allocation5 + $0x180] sm:$0xff]  ;;  %v198_v22 = vld [vmem:[#allocation5 + $0x1f0] sm:$0xff] }
  0x27   :  { %267 = vmatpush.msra.mxu1 %v221_v14  ;;  %309 = vmatpush.msra.mxu3 %v211_v15  ;;  %v199_v23 = vld [vmem:[#allocation5 + $0x1f8] sm:$0xff]  ;;  %v178_v25 = vld [vmem:[#allocation5 + $0x150] sm:$0xff]  ;;  %v192_v26 = vld [vmem:[#allocation5 + $0x1c0] sm:$0xff] }
  0x28   :  { %250 = vmatpush.msra.mxu0 %v202_v8  ;;  %289 = vmatpush.msra.mxu2 %v210_v13  ;;  %v203_v24 = vld [vmem:[#allocation5 + $0x218] sm:$0xff]  ;;  %v193_v27 = vld [vmem:[#allocation5 + $0x1c8] sm:$0xff]  ;;  %v172_v29 = vld [vmem:[#allocation5 + $0x120] sm:$0xff] }
  0x29   :  { %268 = vmatpush.msra.mxu1 %v215_v18  ;;  %310 = vmatpush.msra.mxu3 %v205_v19  ;;  %v197_v28 = vld [vmem:[#allocation5 + $0x1e8] sm:$0xff]  ;;  %v186_v30 = vld [vmem:[#allocation5 + $0x190] sm:$0xff]  ;;  %v187_v31 = vld [vmem:[#allocation5 + $0x198] sm:$0xff] }
  0x2a   :  { %251 = vmatpush.msra.mxu0 %v196_v12  ;;  %290 = vmatpush.msra.mxu2 %v204_v17  ;;  %v191_v32 = vld [vmem:[#allocation5 + $0x1b8] sm:$0xff]  ;;  %v166_v33 = vld [vmem:[#allocation5 + $0xf0] sm:$0xff]  ;;  %v180_v34 = vld [vmem:[#allocation5 + $0x160] sm:$0xff] }
  0x2b   :  { %269 = vmatpush.msra.mxu1 %v209_v20  ;;  %311 = vmatpush.msra.mxu3 %v199_v23  ;;  %v181_v35 = vld [vmem:[#allocation5 + $0x168] sm:$0xff]  ;;  %v160_v37 = vld [vmem:[#allocation5 + $0xc0] sm:$0xff]  ;;  %v174_v38 = vld [vmem:[#allocation5 + $0x130] sm:$0xff] }
  0x2c   :  { %252 = vmatpush.msra.mxu0 %v190_v16  ;;  %291 = vmatpush.msra.mxu2 %v198_v22  ;;  %v185_v36 = vld [vmem:[#allocation5 + $0x188] sm:$0xff]  ;;  %v175_v39 = vld [vmem:[#allocation5 + $0x138] sm:$0xff]  ;;  %v154_v41 = vld [vmem:[#allocation5 + $0x90] sm:$0xff] }
  0x2d   :  { %270 = vmatpush.msra.mxu1 %v203_v24  ;;  %312 = vmatpush.msra.mxu3 %v193_v27  ;;  %v179_v40 = vld [vmem:[#allocation5 + $0x158] sm:$0xff]  ;;  %v168_v42 = vld [vmem:[#allocation5 + $0x100] sm:$0xff]  ;;  %v169_v43 = vld [vmem:[#allocation5 + $0x108] sm:$0xff] }
  0x2e   :  { %253 = vmatpush.msra.mxu0 %v184_v21  ;;  %292 = vmatpush.msra.mxu2 %v192_v26  ;;  %v173_v44 = vld [vmem:[#allocation5 + $0x128] sm:$0xff]  ;;  %v148_v45 = vld [vmem:[#allocation5 + $0x60] sm:$0xff]  ;;  %v162_v46 = vld [vmem:[#allocation5 + $0xd0] sm:$0xff] }
  0x2f   :  { %271 = vmatpush.msra.mxu1 %v197_v28  ;;  %313 = vmatpush.msra.mxu3 %v187_v31  ;;  %v163_v47 = vld [vmem:[#allocation5 + $0xd8] sm:$0xff]  ;;  %v142_v49 = vld [vmem:[#allocation5 + $0x30] sm:$0xff]  ;;  %v156_v50 = vld [vmem:[#allocation5 + $0xa0] sm:$0xff] }
  0x30   :  { %254 = vmatpush.msra.mxu0 %v178_v25  ;;  %293 = vmatpush.msra.mxu2 %v186_v30  ;;  %v167_v48 = vld [vmem:[#allocation5 + $0xf8] sm:$0xff]  ;;  %v157_v51 = vld [vmem:[#allocation5 + $0xa8] sm:$0xff]  ;;  %v136_v53 = vld [vmem:[#allocation5] sm:$0xff] }
  0x31   :  { %272 = vmatpush.msra.mxu1 %v191_v32  ;;  %314 = vmatpush.msra.mxu3 %v181_v35  ;;  %v161_v52 = vld [vmem:[#allocation5 + $0xc8] sm:$0xff]  ;;  %v150_v54 = vld [vmem:[#allocation5 + $0x70] sm:$0xff]  ;;  %v151_v56 = vld [vmem:[#allocation5 + $0x78] sm:$0xff] }
  0x32   :  { %255 = vmatpush.msra.mxu0 %v172_v29  ;;  %294 = vmatpush.msra.mxu2 %v180_v34  ;;  %v230_v55 = vld [vmem:[#allocation5 + $0x2f0] sm:$0xff]  ;;  %v144_v57 = vld [vmem:[#allocation5 + $0x40] sm:$0xff]  ;;  %v1210_v58 = vld [vmem:[#allocation2] sm:$0xff] }
  0x33   :  { %273 = vmatpush.msra.mxu1 %v185_v36  ;;  %315 = vmatpush.msra.mxu3 %v175_v39  ;;  %v224_v59 = vld [vmem:[#allocation5 + $0x2c0] sm:$0xff]  ;;  %v145_v60 = vld [vmem:[#allocation5 + $0x48] sm:$0xff]  ;;  %v155_v61 = vld [vmem:[#allocation5 + $0x98] sm:$0xff] }
  0x34   :  { %256 = vmatpush.msra.mxu0 %v166_v33  ;;  %295 = vmatpush.msra.mxu2 %v174_v38  ;;  %v138_v62 = vld [vmem:[#allocation5 + $0x10] sm:$0xff]  ;;  %v139_v0 = vld [vmem:[#allocation5 + $0x18] sm:$0xff]  ;;  %v212_v1 = vld [vmem:[#allocation5 + $0x260] sm:$0xff] }
  0x35   :  { %274 = vmatpush.msra.mxu1 %v179_v40  ;;  %316 = vmatpush.msra.mxu3 %v169_v43  ;;  %v218_v63 = vld [vmem:[#allocation5 + $0x290] sm:$0xff]  ;;  %v149_v2 = vld [vmem:[#allocation5 + $0x68] sm:$0xff]  ;;  %v143_v4 = vld [vmem:[#allocation5 + $0x38] sm:$0xff] }
  0x36   :  { %257 = vmatpush.msra.mxu0 %v160_v37  ;;  %296 = vmatpush.msra.mxu2 %v168_v42  ;;  %v206_v3 = vld [vmem:[#allocation5 + $0x230] sm:$0xff]  ;;  %v200_v5 = vld [vmem:[#allocation5 + $0x200] sm:$0xff]  ;;  %v137_v6 = vld [vmem:[#allocation5 + $0x8] sm:$0xff] }
  0x37   :  { %275 = vmatpush.msra.mxu1 %v173_v44  ;;  %317 = vmatpush.msra.mxu3 %v163_v47  ;;  %v194_v7 = vld [vmem:[#allocation5 + $0x1d0] sm:$0xff]  ;;  %v231_v8 = vld [vmem:[#allocation5 + $0x2f8] sm:$0xff]  ;;  %v188_v11 = vld [vmem:[#allocation5 + $0x1a0] sm:$0xff] }
  0x38   :  { %258 = vmatpush.msra.mxu0 %v154_v41  ;;  %297 = vmatpush.msra.mxu2 %v162_v46  ;;  %v400_v9 = vld [vmem:[#allocation8 + $0xf8] sm:$0xff]  ;;  %v225_v12 = vld [vmem:[#allocation5 + $0x2c8] sm:$0xff]  ;;  %v399_v13 = vld [vmem:[#allocation8 + $0xf0] sm:$0xff] }
  0x39   :  { %276 = vmatpush.msra.mxu1 %v167_v48  ;;  %318 = vmatpush.msra.mxu3 %v157_v51  ;;  %v382_v10 = vld [vmem:[#allocation8 + $0x78] sm:$0xff]  ;;  %v381_v14 = vld [vmem:[#allocation8 + $0x70] sm:$0xff]  ;;  %v398_v17 = vld [vmem:[#allocation8 + $0xe8] sm:$0xff] }
  0x3a   :  { %259 = vmatpush.msra.mxu0 %v148_v45  ;;  %298 = vmatpush.msra.mxu2 %v156_v50  ;;  %v182_v15 = vld [vmem:[#allocation5 + $0x170] sm:$0xff]  ;;  %v219_v16 = vld [vmem:[#allocation5 + $0x298] sm:$0xff]  ;;  %v176_v19 = vld [vmem:[#allocation5 + $0x140] sm:$0xff] }
  0x3b   :  { %277 = vmatpush.msra.mxu1 %v161_v52  ;;  %319 = vmatpush.msra.mxu3 %v151_v56  ;;  %v380_v18 = vld [vmem:[#allocation8 + $0x68] sm:$0xff]  ;;  %v397_v21 = vld [vmem:[#allocation8 + $0xe0] sm:$0xff]  ;;  %v207_v24 = vld [vmem:[#allocation5 + $0x238] sm:$0xff] }
  0x3c   :  { %260 = vmatpush.msra.mxu0 %v142_v49  ;;  %299 = vmatpush.msra.mxu2 %v150_v54  ;;  %v213_v20 = vld [vmem:[#allocation5 + $0x268] sm:$0xff]  ;;  %v170_v23 = vld [vmem:[#allocation5 + $0x110] sm:$0xff]  ;;  %v396_v25 = vld [vmem:[#allocation8 + $0xd8] sm:$0xff] }
  0x3d   :  { %320 = vmatpush.msra.mxu3 %v145_v60  ;;  %278 = vmatpush.msra.mxu1 %v155_v61  ;;  %v379_v22 = vld [vmem:[#allocation8 + $0x60] sm:$0xff]  ;;  %v378_v26 = vld [vmem:[#allocation8 + $0x58] sm:$0xff]  ;;  %v395_v29 = vld [vmem:[#allocation8 + $0xd0] sm:$0xff] }
  0x3e   :  { %261 = vmatpush.msra.mxu0 %v136_v53  ;;  %300 = vmatpush.msra.mxu2 %v144_v57  ;;  %v164_v27 = vld [vmem:[#allocation5 + $0xe0] sm:$0xff]  ;;  %v201_v28 = vld [vmem:[#allocation5 + $0x208] sm:$0xff]  ;;  %v377_v30 = vld [vmem:[#allocation8 + $0x50] sm:$0xff] }
  0x3f   :  { %262 = vmatmul.f32.vlgmr.msra.gmra.mxu0 %v1210_v58  ;;  %321 = vmatpush.msra.mxu3 %v139_v0  ;;  %v158_v31 = vld [vmem:[#allocation5 + $0xb0] sm:$0xff]  ;;  %v195_v32 = vld [vmem:[#allocation5 + $0x1d8] sm:$0xff]  ;;  %v152_v35 = vld [vmem:[#allocation5 + $0x80] sm:$0xff] }
  0x40   :  { %326 = vmatpush.msrb.mxu0 %v230_v55  ;;  %301 = vmatpush.msra.mxu2 %v138_v62  ;;  %v394_v33 = vld [vmem:[#allocation8 + $0xc8] sm:$0xff]  ;;  %v393_v37 = vld [vmem:[#allocation8 + $0xc0] sm:$0xff]  ;;  %v183_v40 = vld [vmem:[#allocation5 + $0x178] sm:$0xff] }
  0x41   :  { %302 = vmatmul.f32.vlgmr.msra.gmra.mxu2 %v1210_v58  ;;  %322 = vmatmul.f32.vlgmr.msra.gmra.mxu3 %v1210_v58  ;;  %v376_v34 = vld [vmem:[#allocation8 + $0x48] sm:$0xff]  ;;  %v375_v38 = vld [vmem:[#allocation8 + $0x40] sm:$0xff]  ;;  %v392_v41 = vld [vmem:[#allocation8 + $0xb8] sm:$0xff] }
  0x42   :  { %327 = vmatpush.msrb.mxu0 %v224_v59  ;;  %279 = vmatpush.msra.mxu1 %v149_v2  ;;  %v189_v36 = vld [vmem:[#allocation5 + $0x1a8] sm:$0xff]  ;;  %v146_v39 = vld [vmem:[#allocation5 + $0x50] sm:$0xff]  ;;  %v374_v42 = vld [vmem:[#allocation8 + $0x38] sm:$0xff] }
  0x43   :  { %401 = vmatpush.msrb.mxu2 %v400_v9  ;;  %421 = vmatpush.msrb.mxu3 %v382_v10  ;;  %v140_v43 = vld [vmem:[#allocation5 + $0x20] sm:$0xff]  ;;  %v177_v44 = vld [vmem:[#allocation5 + $0x148] sm:$0xff]  ;;  %v171_v45 = vld [vmem:[#allocation5 + $0x118] sm:$0xff] }
  0x44   :  { %328 = vmatpush.msrb.mxu0 %v218_v63  ;;  %280 = vmatpush.msra.mxu1 %v143_v4  ;;  %v458_v46 = vld [vmem:[#allocation8 + $0x178] sm:$0xff]  ;;  %v165_v47 = vld [vmem:[#allocation5 + $0xe8] sm:$0xff]  ;;  %v457_v48 = vld [vmem:[#allocation8 + $0x170] sm:$0xff] }
  0x45   :  { %402 = vmatpush.msrb.mxu2 %v399_v13  ;;  %422 = vmatpush.msrb.mxu3 %v381_v14  ;;  %v159_v49 = vld [vmem:[#allocation5 + $0xb8] sm:$0xff]  ;;  %v456_v50 = vld [vmem:[#allocation8 + $0x168] sm:$0xff]  ;;  %v455_v52 = vld [vmem:[#allocation8 + $0x160] sm:$0xff] }
  0x46   :  { %329 = vmatpush.msrb.mxu0 %v212_v1  ;;  %281 = vmatpush.msra.mxu1 %v137_v6  ;;  %v153_v51 = vld [vmem:[#allocation5 + $0x88] sm:$0xff]  ;;  %v147_v53 = vld [vmem:[#allocation5 + $0x58] sm:$0xff] }
  0x47   :  { %282 = vmatmul.f32.vlgmr.msra.gmra.mxu1 %v1210_v58  ;;  %403 = vmatpush.msrb.mxu2 %v398_v17  ;;  %v454_v54 = vld [vmem:[#allocation8 + $0x158] sm:$0xff]  ;;  %v141_v55 = vld [vmem:[#allocation5 + $0x28] sm:$0xff]  ;;  %v453_v56 = vld [vmem:[#allocation8 + $0x150] sm:$0xff] }
  0x48   :  { %330 = vmatpush.msrb.mxu0 %v206_v3  ;;  %346 = vmatpush.msrb.mxu1 %v231_v8  ;;  %v497_v57 = vld [vmem:[#allocation8 + $0x1f8] sm:$0xff]  ;;  %v452_v59 = vld [vmem:[#allocation8 + $0x148] sm:$0xff]  ;;  %v496_v60 = vld [vmem:[#allocation8 + $0x1f0] sm:$0xff] }
  0x49   :  { %423 = vmatpush.msrb.mxu3 %v380_v18  ;;  %404 = vmatpush.msrb.mxu2 %v397_v21  ;;  %v451_v61 = vld [vmem:[#allocation8 + $0x140] sm:$0xff]  ;;  %v495_v62 = vld [vmem:[#allocation8 + $0x1e8] sm:$0xff]  ;;  %v450_v63 = vld [vmem:[#allocation8 + $0x138] sm:$0xff] }
  0x4a   :  { %331 = vmatpush.msrb.mxu0 %v200_v5  ;;  %347 = vmatpush.msrb.mxu1 %v225_v12  ;;  %v494_v0 = vld [vmem:[#allocation8 + $0x1e0] sm:$0xff]  ;;  %v493_v1 = vld [vmem:[#allocation8 + $0x1d8] sm:$0xff]  ;;  %v492_v2 = vld [vmem:[#allocation8 + $0x1d0] sm:$0xff] }
  0x4b   :  { %424 = vmatpush.msrb.mxu3 %v379_v22  ;;  %405 = vmatpush.msrb.mxu2 %v396_v25  ;;  %v491_v3 = vld [vmem:[#allocation8 + $0x1c8] sm:$0xff]  ;;  %v490_v4 = vld [vmem:[#allocation8 + $0x1c0] sm:$0xff]  ;;  %v489_v5 = vld [vmem:[#allocation8 + $0x1b8] sm:$0xff] }
  0x4c   :  { %332 = vmatpush.msrb.mxu0 %v194_v7  ;;  %348 = vmatpush.msrb.mxu1 %v219_v16  ;;  %v391_v6 = vld [vmem:[#allocation8 + $0xb0] sm:$0xff]  ;;  %v390_v9 = vld [vmem:[#allocation8 + $0xa8] sm:$0xff]  ;;  %v389_v13 = vld [vmem:[#allocation8 + $0xa0] sm:$0xff] }
  0x4d   :  { %425 = vmatpush.msrb.mxu3 %v378_v26  ;;  %406 = vmatpush.msrb.mxu2 %v395_v29  ;;  %v373_v7 = vld [vmem:[#allocation8 + $0x30] sm:$0xff]  ;;  %v372_v10 = vld [vmem:[#allocation8 + $0x28] sm:$0xff]  ;;  %v371_v14 = vld [vmem:[#allocation8 + $0x20] sm:$0xff] }
  0x4e   :  { %333 = vmatpush.msrb.mxu0 %v188_v11  ;;  %349 = vmatpush.msrb.mxu1 %v213_v20  ;;  %v488_v8 = vld [vmem:[#allocation8 + $0x1b0] sm:$0xff]  ;;  %v448_v11 = vld [vmem:[#allocation8 + $0x128] sm:$0xff]  ;;  %v486_v16 = vld [vmem:[#allocation8 + $0x1a0] sm:$0xff] }
  0x4f   :  { %426 = vmatpush.msrb.mxu3 %v377_v30  ;;  %407 = vmatpush.msrb.mxu2 %v394_v33  ;;  %v487_v12 = vld [vmem:[#allocation8 + $0x1a8] sm:$0xff]  ;;  %v388_v17 = vld [vmem:[#allocation8 + $0x98] sm:$0xff]  ;;  %v387_v21 = vld [vmem:[#allocation8 + $0x90] sm:$0xff] }
  0x50   :  { %334 = vmatpush.msrb.mxu0 %v182_v15  ;;  %350 = vmatpush.msrb.mxu1 %v207_v24  ;;  %v447_v15 = vld [vmem:[#allocation8 + $0x120] sm:$0xff]  ;;  %v370_v18 = vld [vmem:[#allocation8 + $0x18] sm:$0xff]  ;;  %v369_v22 = vld [vmem:[#allocation8 + $0x10] sm:$0xff] }
  0x51   :  { %427 = vmatpush.msrb.mxu3 %v376_v34  ;;  %408 = vmatpush.msrb.mxu2 %v393_v37  ;;  %v485_v20 = vld [vmem:[#allocation8 + $0x198] sm:$0xff]  ;;  %v484_v24 = vld [vmem:[#allocation8 + $0x190] sm:$0xff]  ;;  %v386_v25 = vld [vmem:[#allocation8 + $0x88] sm:$0xff] }
  0x52   :  { %335 = vmatpush.msrb.mxu0 %v176_v19  ;;  %351 = vmatpush.msrb.mxu1 %v201_v28  ;;  %v446_v19 = vld [vmem:[#allocation8 + $0x118] sm:$0xff]  ;;  %v368_v26 = vld [vmem:[#allocation8 + $0x8] sm:$0xff]  ;;  %v385_v29 = vld [vmem:[#allocation8 + $0x80] sm:$0xff] }
  0x53   :  { %428 = vmatpush.msrb.mxu3 %v375_v38  ;;  %409 = vmatpush.msrb.mxu2 %v392_v41  ;;  %v483_v28 = vld [vmem:[#allocation8 + $0x188] sm:$0xff]  ;;  %v367_v30 = vld [vmem:[#allocation8] sm:$0xff]  ;;  %v1218_v34 = vld [vmem:[#allocation7] sm:$0x3f] }
  0x54   :  { %336 = vmatpush.msrb.mxu0 %v170_v23  ;;  %352 = vmatpush.msrb.mxu1 %v195_v32  ;;  %v445_v23 = vld [vmem:[#allocation8 + $0x110] sm:$0xff]  ;;  %v482_v32 = vld [vmem:[#allocation8 + $0x180] sm:$0xff]  ;;  %v236_v37 = vperm.slane %v1218_v34, 2  ;;  %v237_v38 = vperm.slane %v1218_v34, 3  ;;  %v234_v41 = vperm.slane %v1218_v34, 0 }
  0x55   :  { %429 = vmatpush.msrb.mxu3 %v374_v42  ;;  %410 = vmatpush.msrb.mxu2 %v391_v6  ;;  %v238_v42 = vperm.slane %v1218_v34, 4 }
  0x56   :  { %337 = vmatpush.msrb.mxu0 %v164_v27  ;;  %353 = vmatpush.msrb.mxu1 %v189_v36  ;;  %v444_v27 = vld [vmem:[#allocation8 + $0x108] sm:$0xff] }
  0x57   :  { %430 = vmatpush.msrb.mxu3 %v373_v7  ;;  %411 = vmatpush.msrb.mxu2 %v390_v9  ;;  %v527_v9 = vld [vmem:[#allocation10 + $0x18] sm:$0xff] }
  0x58   :  { %338 = vmatpush.msrb.mxu0 %v158_v31  ;;  %354 = vmatpush.msrb.mxu1 %v183_v40  ;;  %v443_v31 = vld [vmem:[#allocation8 + $0x100] sm:$0xff] }
  0x59   :  { %431 = vmatpush.msrb.mxu3 %v372_v10  ;;  %412 = vmatpush.msrb.mxu2 %v389_v13  ;;  %v526_v10 = vld [vmem:[#allocation10 + $0x10] sm:$0xff]  ;;  %v590_v13 = vld [vmem:[#allocation11 + $0x78] sm:$0xff] }
  0x5a   :  { %339 = vmatpush.msrb.mxu0 %v152_v35  ;;  %355 = vmatpush.msrb.mxu1 %v177_v44  ;;  %v235_v35 = vperm.slane %v1218_v34, 1 }
  0x5b   :  { %432 = vmatpush.msrb.mxu3 %v371_v14  ;;  %413 = vmatpush.msrb.mxu2 %v388_v17  ;;  %v589_v14 = vld [vmem:[#allocation11 + $0x70] sm:$0xff]  ;;  %v644_v17 = vld [vmem:[#allocation11 + $0xf8] sm:$0xff] }
  0x5c   :  { %340 = vmatpush.msrb.mxu0 %v146_v39  ;;  %356 = vmatpush.msrb.mxu1 %v171_v45 }
  0x5d   :  { %433 = vmatpush.msrb.mxu3 %v370_v18  ;;  %414 = vmatpush.msrb.mxu2 %v387_v21  ;;  %v643_v18 = vld [vmem:[#allocation11 + $0xf0] sm:$0xff] }
  0x5e   :  { %341 = vmatpush.msrb.mxu0 %v140_v43  ;;  %357 = vmatpush.msrb.mxu1 %v165_v47  ;;  %v585_v21 = vld [vmem:[#allocation11 + $0x50] sm:$0xff] }
  0x5f   :  { %342 = vmatmul.f32.vlgmr.msrb.gmra.mxu0 %v1210_v58  ;;  %434 = vmatpush.msrb.mxu3 %v369_v22  ;;  %v641_v22 = vld [vmem:[#allocation11 + $0xe0] sm:$0xff] }
  0x60   :  { %459 = vmatpush.msra.mxu0 %v458_v46  ;;  %358 = vmatpush.msrb.mxu1 %v159_v49 }
  0x61   :  { %415 = vmatpush.msrb.mxu2 %v386_v25  ;;  %435 = vmatpush.msrb.mxu3 %v368_v26  ;;  %v583_v25 = vld [vmem:[#allocation11 + $0x40] sm:$0xff]  ;;  %v639_v26 = vld [vmem:[#allocation11 + $0xd0] sm:$0xff] }
  0x62   :  { %460 = vmatpush.msra.mxu0 %v457_v48  ;;  %359 = vmatpush.msrb.mxu1 %v153_v51 }
  0x63   :  { %416 = vmatpush.msrb.mxu2 %v385_v29  ;;  %436 = vmatpush.msrb.mxu3 %v367_v30  ;;  %v580_v29 = vld [vmem:[#allocation11 + $0x28] sm:$0xff] }
  0x64   :  { %461 = vmatpush.msra.mxu0 %v456_v50  ;;  %360 = vmatpush.msrb.mxu1 %v147_v53  ;;  %v539_v53 = vld [vmem:[#allocation10 + $0x78] sm:$0xff] }
  0x65   :  { %540 = vmatpush.msra.mxu2 %v539_v53  ;;  %591 = vmatpush.msra.mxu3 %v590_v13  ;;  %v732_v53 = vld [vmem:[#allocation11 + $0x140] sm:$0xff]  ;;  %v777_v13 = vld [vmem:[#allocation13 + $0x178] sm:$0xff] }
  0x66   :  { %462 = vmatpush.msra.mxu0 %v455_v52  ;;  %361 = vmatpush.msrb.mxu1 %v141_v55  ;;  %v537_v55 = vld [vmem:[#allocation10 + $0x68] sm:$0xff] }
  0x67   :  { %362 = vmatmul.f32.vlgmr.msrb.gmra.mxu1 %v1210_v58  ;;  %v449_v58 = vld [vmem:[#allocation8 + $0x130] sm:$0xff]  ;;  %592 = vmatpush.msra.mxu3 %v589_v14  ;;  %v624_v14 = vld [vmem:[#allocation13 + $0x60] sm:$0xff] }
  0x68   :  { %463 = vmatpush.msra.mxu0 %v454_v54  ;;  %498 = vmatpush.msra.mxu1 %v497_v57  ;;  %v538_v54 = vld [vmem:[#allocation10 + $0x70] sm:$0xff]  ;;  %v535_v57 = vld [vmem:[#allocation10 + $0x58] sm:$0xff] }
  0x69   :  { %541 = vmatpush.msra.mxu2 %v538_v54  ;;  %v632_v54 = vld [vmem:[#allocation11 + $0x98] sm:$0xff] }
  0x6a   :  { %464 = vmatpush.msra.mxu0 %v453_v56  ;;  %499 = vmatpush.msra.mxu1 %v496_v60  ;;  %v536_v56 = vld [vmem:[#allocation10 + $0x60] sm:$0xff]  ;;  %v533_v60 = vld [vmem:[#allocation10 + $0x48] sm:$0xff] }
  0x6b   :  { %542 = vmatpush.msra.mxu2 %v537_v55  ;;  %v731_v55 = vld [vmem:[#allocation11 + $0x138] sm:$0xff] }
  0x6c   :  { %465 = vmatpush.msra.mxu0 %v452_v59  ;;  %500 = vmatpush.msra.mxu1 %v495_v62  ;;  %v534_v59 = vld [vmem:[#allocation10 + $0x50] sm:$0xff]  ;;  %v531_v62 = vld [vmem:[#allocation10 + $0x38] sm:$0xff] }
  0x6d   :  { %543 = vmatpush.msra.mxu2 %v536_v56  ;;  %v631_v56 = vld [vmem:[#allocation11 + $0x90] sm:$0xff] }
  0x6e   :  { %466 = vmatpush.msra.mxu0 %v451_v61  ;;  %501 = vmatpush.msra.mxu1 %v494_v0  ;;  %v532_v61 = vld [vmem:[#allocation10 + $0x40] sm:$0xff] }
  0x6f   :  { %544 = vmatpush.msra.mxu2 %v535_v57  ;;  %v730_v57 = vld [vmem:[#allocation11 + $0x130] sm:$0xff] }
  0x70   :  { %467 = vmatpush.msra.mxu0 %v450_v63  ;;  %502 = vmatpush.msra.mxu1 %v493_v1  ;;  %v530_v63 = vld [vmem:[#allocation10 + $0x30] sm:$0xff] }
  0x71   :  { %545 = vmatpush.msra.mxu2 %v534_v59  ;;  %v630_v59 = vld [vmem:[#allocation11 + $0x88] sm:$0xff] }
  0x72   :  { %503 = vmatpush.msra.mxu1 %v492_v2  ;;  %468 = vmatpush.msra.mxu0 %v449_v58  ;;  %v529_v58 = vld [vmem:[#allocation10 + $0x28] sm:$0xff] }
  0x73   :  { %546 = vmatpush.msra.mxu2 %v533_v60  ;;  %v729_v60 = vld [vmem:[#allocation11 + $0x128] sm:$0xff] }
  0x74   :  { %504 = vmatpush.msra.mxu1 %v491_v3  ;;  %469 = vmatpush.msra.mxu0 %v448_v11  ;;  %v525_v11 = vld [vmem:[#allocation10 + $0x8] sm:$0xff] }
  0x75   :  { %547 = vmatpush.msra.mxu2 %v532_v61  ;;  %v629_v61 = vld [vmem:[#allocation11 + $0x80] sm:$0xff] }
  0x76   :  { %505 = vmatpush.msra.mxu1 %v490_v4  ;;  %470 = vmatpush.msra.mxu0 %v447_v15  ;;  %v588_v15 = vld [vmem:[#allocation11 + $0x68] sm:$0xff] }
  0x77   :  { %548 = vmatpush.msra.mxu2 %v531_v62  ;;  %593 = vmatpush.msra.mxu3 %v588_v15  ;;  %v728_v62 = vld [vmem:[#allocation11 + $0x120] sm:$0xff]  ;;  %v776_v15 = vld [vmem:[#allocation13 + $0x170] sm:$0xff] }
  0x78   :  { %506 = vmatpush.msra.mxu1 %v489_v5  ;;  %471 = vmatpush.msra.mxu0 %v446_v19  ;;  %v586_v19 = vld [vmem:[#allocation11 + $0x58] sm:$0xff] }
  0x79   :  { %549 = vmatpush.msra.mxu2 %v530_v63  ;;  %v727_v63 = vld [vmem:[#allocation11 + $0x118] sm:$0xff] }
  0x7a   :  { %507 = vmatpush.msra.mxu1 %v488_v8  ;;  %472 = vmatpush.msra.mxu0 %v445_v23  ;;  %v528_v8 = vld [vmem:[#allocation10 + $0x20] sm:$0xff]  ;;  %v584_v23 = vld [vmem:[#allocation11 + $0x48] sm:$0xff] }
  0x7b   :  { %550 = vmatpush.msra.mxu2 %v529_v58  ;;  %v679_v58 = vld [vmem:[#allocation13 + $0xe0] sm:$0xff] }
  0x7c   :  { %508 = vmatpush.msra.mxu1 %v487_v12  ;;  %473 = vmatpush.msra.mxu0 %v444_v27  ;;  %v524_v12 = vld [vmem:[#allocation10] sm:$0xff]  ;;  %v582_v27 = vld [vmem:[#allocation11 + $0x38] sm:$0xff] }
  0x7d   :  { %551 = vmatpush.msra.mxu2 %v528_v8  ;;  %v627_v8 = vld [vmem:[#allocation13 + $0x78] sm:$0xff] }
  0x7e   :  { %509 = vmatpush.msra.mxu1 %v486_v16  ;;  %474 = vmatpush.msra.mxu0 %v443_v31  ;;  %v587_v16 = vld [vmem:[#allocation11 + $0x60] sm:$0xff] }
  0x7f   :  { %552 = vmatpush.msra.mxu2 %v527_v9  ;;  %594 = vmatpush.msra.mxu3 %v587_v16  ;;  %v579_v31 = vld [vmem:[#allocation11 + $0x20] sm:$0xff]  ;;  %v626_v9 = vld [vmem:[#allocation13 + $0x70] sm:$0xff]  ;;  %v676_v16 = vld [vmem:[#allocation13 + $0xc8] sm:$0xff] }
  0x80   :  { %510 = vmatpush.msra.mxu1 %v485_v20  ;;  %645 = vmatpush.msrb.mxu0 %v644_v17  ;;  %v642_v20 = vld [vmem:[#allocation11 + $0xe8] sm:$0xff] }
  0x81   :  { %553 = vmatpush.msra.mxu2 %v526_v10  ;;  %595 = vmatpush.msra.mxu3 %v586_v19  ;;  %v678_v10 = vld [vmem:[#allocation13 + $0xd8] sm:$0xff]  ;;  %v775_v17 = vld [vmem:[#allocation13 + $0x168] sm:$0xff] }
  0x82   :  { %511 = vmatpush.msra.mxu1 %v484_v24  ;;  %646 = vmatpush.msrb.mxu0 %v643_v18  ;;  %v640_v24 = vld [vmem:[#allocation11 + $0xd8] sm:$0xff] }
  0x83   :  { %554 = vmatpush.msra.mxu2 %v525_v11  ;;  %596 = vmatpush.msra.mxu3 %v585_v21  ;;  %v625_v11 = vld [vmem:[#allocation13 + $0x68] sm:$0xff]  ;;  %v623_v19 = vld [vmem:[#allocation13 + $0x58] sm:$0xff]  ;;  %v675_v21 = vld [vmem:[#allocation13 + $0xc0] sm:$0xff] }
  0x84   :  { %512 = vmatpush.msra.mxu1 %v483_v28  ;;  %647 = vmatpush.msrb.mxu0 %v642_v20  ;;  %v581_v28 = vld [vmem:[#allocation11 + $0x30] sm:$0xff] }
  0x85   :  { %555 = vmatpush.msra.mxu2 %v524_v12  ;;  %597 = vmatpush.msra.mxu3 %v584_v23  ;;  %v677_v12 = vld [vmem:[#allocation13 + $0xd0] sm:$0xff] }
  0x86   :  { %513 = vmatpush.msra.mxu1 %v482_v32  ;;  %648 = vmatpush.msrb.mxu0 %v641_v22  ;;  %v774_v22 = vld [vmem:[#allocation13 + $0x160] sm:$0xff]  ;;  %v622_v23 = vld [vmem:[#allocation13 + $0x50] sm:$0xff] }
  0x87   :  { %598 = vmatpush.msra.mxu3 %v583_v25  ;;  %v674_v25 = vld [vmem:[#allocation13 + $0xb8] sm:$0xff] }
  0x88   :  { %649 = vmatpush.msrb.mxu0 %v640_v24 }
  0x89   :  { %599 = vmatpush.msra.mxu3 %v582_v27 }
  0x8a   :  { %650 = vmatpush.msrb.mxu0 %v639_v26  ;;  %v773_v26 = vld [vmem:[#allocation13 + $0x158] sm:$0xff] }
  0x8b   :  { %600 = vmatpush.msra.mxu3 %v581_v28  ;;  %v621_v28 = vld [vmem:[#allocation13 + $0x48] sm:$0xff] }
  0x8d   :  { %601 = vmatpush.msra.mxu3 %v580_v29 }
  0x8f   :  { %602 = vmatpush.msra.mxu3 %v579_v31  ;;  %v673_v31 = vld [vmem:[#allocation13 + $0xb0] sm:$0xff] }
  0xbc   :  { %v263_v33 = vpop.f32.mrf.mxu0 }
  0xbd   :  { %v264_v47 = vadd.f32 %v263_v33, %v234_v41  ;;  %v578_v33 = vld [vmem:[#allocation11 + $0x18] sm:$0xff]  ;;  %v738_v41 = vld [vmem:[#allocation11 + $0x170] sm:$0xff] }
  0xbe   :  { %603 = vmatpush.msra.mxu3 %v578_v33  ;;  %v620_v33 = vld [vmem:[#allocation13 + $0x40] sm:$0xff] }
  0xc4   :  { %v283_v36 = vpop.f32.mrf.mxu1  ;;  %v303_v39 = vpop.f32.mrf.mxu2 }
  0xc5   :  { %v323_v40 = vpop.f32.mrf.mxu3  ;;  %v284_v43 = vadd.f32 %v283_v36, %v235_v35  ;;  %v304_v44 = vadd.f32 %v303_v39, %v236_v37  ;;  %v577_v36 = vld [vmem:[#allocation11 + $0x10] sm:$0xff]  ;;  %v576_v37 = vld [vmem:[#allocation11 + $0x8] sm:$0xff]  ;;  %v739_v39 = vld [vmem:[#allocation11 + $0x178] sm:$0xff] }
  0xc6   :  { %v324_v45 = vadd.f32 %v323_v40, %v237_v38  ;;  %604 = vmatpush.msra.mxu3 %v577_v36  ;;  %v575_v38 = vld [vmem:[#allocation11] sm:$0xff]  ;;  %v672_v36 = vld [vmem:[#allocation13 + $0xa8] sm:$0xff] }
  0xc8   :  { %605 = vmatpush.msra.mxu3 %v576_v37  ;;  %v771_v37 = vld [vmem:[#allocation13 + $0x148] sm:$0xff] }
  0xca   :  { %606 = vmatpush.msra.mxu3 %v575_v38 }
  0xdc   :  { %v343_v46 = vpop.f32.mrf.mxu0 }
  0xdd   :  { %v344_v48 = vadd.f32 %v343_v46, %v238_v42  ;;  %v638_v42 = vld [vmem:[#allocation11 + $0xc8] sm:$0xff]  ;;  %v636_v46 = vld [vmem:[#allocation11 + $0xb8] sm:$0xff] }
  0xde   :  { %651 = vmatpush.msrb.mxu0 %v638_v42  ;;  %v671_v42 = vld [vmem:[#allocation13 + $0xa0] sm:$0xff] }
  0xdf   :  { %v383_v49 = vmul.f32 %v344_v48, %v284_v43  ;;  %v366_v50 = vmul.f32 %v344_v48, %v264_v47  ;;  %v441_v51 = vmul.f32 %v344_v48, %v304_v44  ;;  %v480_v52 = vmul.f32 %v344_v48, %v324_v45  ;;  %v737_v43 = vld [vmem:[#allocation11 + $0x168] sm:$0xff]  ;;  %v637_v44 = vld [vmem:[#allocation11 + $0xc0] sm:$0xff]  ;;  %v735_v47 = vld [vmem:[#allocation11 + $0x158] sm:$0xff] }
  0xe0   :  { %v736_v45 = vld [vmem:[#allocation11 + $0x160] sm:$0xff]  ;;  %652 = vmatpush.msrb.mxu0 %v637_v44  ;;  %v635_v48 = vld [vmem:[#allocation11 + $0xb0] sm:$0xff] }
  0xe1   :  { %417 = vmatmul.f32.vlgmr.msrb.gmra.mxu2 %v383_v49  ;;  %437 = vmatmul.f32.vlgmr.msrb.gmra.mxu3 %v366_v50  ;;  %v734_v49 = vld [vmem:[#allocation11 + $0x150] sm:$0xff]  ;;  %v634_v50 = vld [vmem:[#allocation11 + $0xa8] sm:$0xff] }
  0xe2   :  { %475 = vmatmul.f32.vlgmr.msra.gmra.mxu0 %v441_v51  ;;  %514 = vmatmul.f32.vlgmr.msra.gmra.mxu1 %v480_v52  ;;  %v733_v51 = vld [vmem:[#allocation11 + $0x148] sm:$0xff]  ;;  %v633_v52 = vld [vmem:[#allocation11 + $0xa0] sm:$0xff] }
  0xe3   :  { %740 = vmatpush.msrb.mxu3 %v739_v39  ;;  %653 = vmatpush.msrb.mxu0 %v636_v46  ;;  %v619_v39 = vld [vmem:[#allocation13 + $0x38] sm:$0xff]  ;;  %v618_v46 = vld [vmem:[#allocation13 + $0x30] sm:$0xff] }
  0xe4   :  { %v1225_v0 = vpop.f32.mrf.mxu1  ;;  %703 = vmatpush.msrb.mxu2 %v627_v8  ;;  %v802_v8 = vld [vmem:[#allocation11 + $0x190] sm:$0xff] }
  0xe5   :  { %741 = vmatpush.msrb.mxu3 %v738_v41  ;;  %654 = vmatpush.msrb.mxu0 %v635_v48  ;;  %v617_v48 = vld [vmem:[#allocation13 + $0x28] sm:$0xff] }
  0xe6   :  { %704 = vmatpush.msrb.mxu2 %v626_v9  ;;  %v612_v9 = vld [vmem:[#allocation13] sm:$0xff] }
  0xe7   :  { %742 = vmatpush.msrb.mxu3 %v737_v43  ;;  %655 = vmatpush.msrb.mxu0 %v634_v50  ;;  %v667_v50 = vld [vmem:[#allocation13 + $0x80] sm:$0xff] }
  0xe8   :  { %705 = vmatpush.msrb.mxu2 %v625_v11  ;;  %v801_v11 = vld [vmem:[#allocation11 + $0x188] sm:$0xff] }
  0xe9   :  { %743 = vmatpush.msrb.mxu3 %v736_v45  ;;  %656 = vmatpush.msrb.mxu0 %v633_v52  ;;  %v670_v45 = vld [vmem:[#allocation13 + $0x98] sm:$0xff]  ;;  %v813_v52 = vld [vmem:[#allocation11 + $0x1e8] sm:$0xff] }
  0xea   :  { %706 = vmatpush.msrb.mxu2 %v624_v14  ;;  %v764_v14 = vld [vmem:[#allocation13 + $0x110] sm:$0xff] }
  0xeb   :  { %744 = vmatpush.msrb.mxu3 %v735_v47  ;;  %657 = vmatpush.msrb.mxu0 %v632_v54  ;;  %v669_v47 = vld [vmem:[#allocation13 + $0x90] sm:$0xff]  ;;  %v811_v54 = vld [vmem:[#allocation11 + $0x1d8] sm:$0xff] }
  0xec   :  { %707 = vmatpush.msrb.mxu2 %v623_v19  ;;  %v851_v19 = vld [vmem:[#allocation13 + $0x1e8] sm:$0xff] }
  0xed   :  { %745 = vmatpush.msrb.mxu3 %v734_v49  ;;  %658 = vmatpush.msrb.mxu0 %v631_v56  ;;  %v668_v49 = vld [vmem:[#allocation13 + $0x88] sm:$0xff] }
  0xee   :  { %708 = vmatpush.msrb.mxu2 %v622_v23  ;;  %v809_v56 = vld [vmem:[#allocation11 + $0x1c8] sm:$0xff]  ;;  %v239_v23 = vperm.slane %v1218_v34, 5 }
  0xef   :  { %746 = vmatpush.msrb.mxu3 %v733_v51  ;;  %659 = vmatpush.msrb.mxu0 %v630_v59  ;;  %v815_v51 = vld [vmem:[#allocation11 + $0x1f8] sm:$0xff] }
  0xf0   :  { %709 = vmatpush.msrb.mxu2 %v621_v28  ;;  %v807_v59 = vld [vmem:[#allocation11 + $0x1b8] sm:$0xff] }
  0xf1   :  { %747 = vmatpush.msrb.mxu3 %v732_v53  ;;  %660 = vmatpush.msrb.mxu0 %v629_v61  ;;  %v812_v53 = vld [vmem:[#allocation11 + $0x1e0] sm:$0xff] }
  0xf2   :  { %710 = vmatpush.msrb.mxu2 %v620_v33  ;;  %v616_v61 = vld [vmem:[#allocation13 + $0x20] sm:$0xff] }
  0xf3   :  { %748 = vmatpush.msrb.mxu3 %v731_v55  ;;  %778 = vmatpush.msra.mxu0 %v777_v13  ;;  %v810_v55 = vld [vmem:[#allocation11 + $0x1d0] sm:$0xff]  ;;  %v800_v13 = vld [vmem:[#allocation11 + $0x180] sm:$0xff] }
  0xf4   :  { %711 = vmatpush.msrb.mxu2 %v619_v39  ;;  %v838_v39 = vld [vmem:[#allocation13 + $0x180] sm:$0xff] }
  0xf5   :  { %749 = vmatpush.msrb.mxu3 %v730_v57  ;;  %779 = vmatpush.msra.mxu0 %v776_v15  ;;  %v808_v57 = vld [vmem:[#allocation11 + $0x1c0] sm:$0xff]  ;;  %v763_v15 = vld [vmem:[#allocation13 + $0x108] sm:$0xff] }
  0xf6   :  { %712 = vmatpush.msrb.mxu2 %v618_v46 }
  0xf7   :  { %750 = vmatpush.msrb.mxu3 %v729_v60  ;;  %780 = vmatpush.msra.mxu0 %v775_v17  ;;  %v806_v60 = vld [vmem:[#allocation11 + $0x1b0] sm:$0xff]  ;;  %v853_v17 = vld [vmem:[#allocation13 + $0x1f8] sm:$0xff] }
  0xf8   :  { %713 = vmatpush.msrb.mxu2 %v617_v48  ;;  %v913_v48 = vld [vmem:[%s1252_s7] ss:$0 sm:$0xff] }
  0xf9   :  { %751 = vmatpush.msrb.mxu3 %v728_v62  ;;  %781 = vmatpush.msra.mxu0 %v774_v22  ;;  %v770_v62 = vld [vmem:[#allocation13 + $0x140] sm:$0xff]  ;;  %v848_v22 = vld [vmem:[#allocation13 + $0x1d0] sm:$0xff] }
  0xfa   :  { %714 = vmatpush.msrb.mxu2 %v616_v61 }
  0xfb   :  { %752 = vmatpush.msrb.mxu3 %v727_v63  ;;  %782 = vmatpush.msra.mxu0 %v773_v26  ;;  %v805_v63 = vld [vmem:[#allocation11 + $0x1a8] sm:$0xff]  ;;  %v364_v26 = vadd.f32 %v1225_v0, %v239_v23  ;;  %v841_v0 = vld [vmem:[#allocation13 + $0x198] sm:$0xff] }
 0x15f   :  { %v476_v4 = vpop.f32.mrf.mxu0  ;;  %v515_v6 = vpop.f32.mrf.mxu1 }
 0x164   :  { %v418_v1 = vpop.f32.mrf.mxu2  ;;  %v438_v2 = vpop.f32.mrf.mxu3 }
 0x165   :  { %v439_v3 = vadd.f32 %v438_v2, %v418_v1  ;;  %v726_v1 = vld [vmem:[#allocation11 + $0x110] sm:$0xff]  ;;  %v725_v2 = vld [vmem:[#allocation11 + $0x108] sm:$0xff] }
 0x166   :  { %753 = vmatpush.msrb.mxu3 %v726_v1  ;;  %v615_v1 = vld [vmem:[#allocation13 + $0x18] sm:$0xff] }
 0x167   :  { %v479_v5 = vadd.f32 %v476_v4, %v439_v3  ;;  %v724_v3 = vld [vmem:[#allocation11 + $0x100] sm:$0xff]  ;;  %v682_v4 = vld [vmem:[#allocation13 + $0xf8] sm:$0xff]  ;;  %715 = vmatpush.msrb.mxu2 %v615_v1 }
 0x168   :  { %754 = vmatpush.msrb.mxu3 %v725_v2  ;;  %683 = vmatpush.msrb.mxu1 %v682_v4  ;;  %v769_v2 = vld [vmem:[#allocation13 + $0x138] sm:$0xff]  ;;  %v614_v4 = vld [vmem:[#allocation13 + $0x10] sm:$0xff] }
 0x169   :  { %v518_v7 = vadd.f32 %v515_v6, %v479_v5  ;;  %v681_v5 = vld [vmem:[#allocation13 + $0xf0] sm:$0xff]  ;;  %v680_v6 = vld [vmem:[#allocation13 + $0xe8] sm:$0xff]  ;;  %716 = vmatpush.msrb.mxu2 %v614_v4 }
 0x16a   :  { %755 = vmatpush.msrb.mxu3 %v724_v3  ;;  %684 = vmatpush.msrb.mxu1 %v681_v5  ;;  %v804_v3 = vld [vmem:[#allocation11 + $0x1a0] sm:$0xff]  ;;  %v768_v5 = vld [vmem:[#allocation13 + $0x130] sm:$0xff] }
 0x16b   :  { %519 = vmax.xlane.f32.xlu0 %v518_v7 }
 0x16c   :  { %685 = vmatpush.msrb.mxu1 %v680_v6  ;;  %v803_v6 = vld [vmem:[#allocation11 + $0x198] sm:$0xff] }
 0x16e   :  { %686 = vmatpush.msrb.mxu1 %v679_v58  ;;  %v767_v58 = vld [vmem:[#allocation13 + $0x128] sm:$0xff] }
 0x170   :  { %687 = vmatpush.msrb.mxu1 %v678_v10  ;;  %v766_v10 = vld [vmem:[#allocation13 + $0x120] sm:$0xff] }
 0x172   :  { %688 = vmatpush.msrb.mxu1 %v677_v12  ;;  %v765_v12 = vld [vmem:[#allocation13 + $0x118] sm:$0xff] }
 0x174   :  { %689 = vmatpush.msrb.mxu1 %v676_v16  ;;  %v762_v16 = vld [vmem:[#allocation13 + $0x100] sm:$0xff] }
 0x176   :  { %690 = vmatpush.msrb.mxu1 %v675_v21  ;;  %v849_v21 = vld [vmem:[#allocation13 + $0x1d8] sm:$0xff] }
 0x178   :  { %691 = vmatpush.msrb.mxu1 %v674_v25  ;;  %v846_v25 = vld [vmem:[#allocation13 + $0x1c0] sm:$0xff] }
 0x17a   :  { %692 = vmatpush.msrb.mxu1 %v673_v31 }
 0x17c   :  { %693 = vmatpush.msrb.mxu1 %v672_v36  ;;  %v842_v36 = vld [vmem:[#allocation13 + $0x1a0] sm:$0xff] }
 0x17e   :  { %694 = vmatpush.msrb.mxu1 %v671_v42 }
 0x180   :  { %695 = vmatpush.msrb.mxu1 %v670_v45 }
 0x182   :  { %696 = vmatpush.msrb.mxu1 %v669_v47 }
 0x184   :  { %697 = vmatpush.msrb.mxu1 %v668_v49 }
 0x186   :  { %698 = vmatpush.msrb.mxu1 %v667_v50 }
 0x188   :  { %816 = vmatpush.msra.mxu1 %v815_v51 }
 0x1de   :  { %v520_v30 = vpop.xlane.xlu0 %519 }
 0x1df   :  { %v521_v32 = vsub.f32 %v518_v7, %v520_v30 }
 0x1e1   :  { %v522_v35 = vmul.f32 1.442695, %v521_v32  ;;  %v772_v32 = vld [vmem:[#allocation13 + $0x150] sm:$0xff] }
 0x1e2   :  { %783 = vmatpush.msra.mxu0 %v772_v32 }
 0x1e3   :  { %914 = vpow2.f32 %v522_v35 }
 0x1e4   :  { %784 = vmatpush.msra.mxu0 %v771_v37  ;;  %v840_v37 = vld [vmem:[#allocation13 + $0x190] sm:$0xff] }
 0x1e6   :  { %785 = vmatpush.msra.mxu0 %v770_v62 }
 0x1e8   :  { %786 = vmatpush.msra.mxu0 %v769_v2 }
 0x1e9   :  { %v1227_v40 = vpop.eup %914 }
 0x1ea   :  { %556 = vmatmul.f32.vlgmr.msra.gmra.mxu2 %v1227_v40  ;;  %787 = vmatpush.msra.mxu0 %v768_v5 }
 0x1ec   :  { %788 = vmatpush.msra.mxu0 %v767_v58 }
 0x1ee   :  { %789 = vmatpush.msra.mxu0 %v766_v10 }
 0x1f0   :  { %790 = vmatpush.msra.mxu0 %v765_v12 }
 0x1f2   :  { %791 = vmatpush.msra.mxu0 %v764_v14 }
 0x1f4   :  { %792 = vmatpush.msra.mxu0 %v763_v15 }
 0x1f6   :  { %793 = vmatpush.msra.mxu0 %v762_v16 }
 0x26d   :  { %v557_v7 = vpop.f32.mrf.mxu2 }
 0x26e   :  { %916 = vrcp.f32 %v557_v7  ;;  %v571_v27 = vand.u32 2147483648, %v557_v7  ;;  %v569_v30 = vand.u32 2147483647, %v557_v7  ;;  %vm565_vm1 = vweird.f32 %v557_v7 }
 0x270   :  { %v572_v38 = vor.u32 1.1754944e-38, %v571_v27  ;;  %vm570_vm3 = vcmp.eq.f32.partialorder %v569_v30, 8.507059e+37  ;;  %v845_v27 = vld [vmem:[#allocation13 + $0x1b8] sm:$0xff]  ;;  %v844_v30 = vld [vmem:[#allocation13 + $0x1b0] sm:$0xff] }
 0x274   :  { %v917_v18 = vpop.eup %916 }
 0x275   :  { %v561_v20 = vmul.f32 %v917_v18, %v557_v7  ;;  %vm566_vm0 = vweird.f32 %v917_v18  ;;  %v613_v7 = vld [vmem:[#allocation13 + $0x8] sm:$0xff] }
 0x276   :  { %vm567_vm2 = vmor %vm565_vm1, %vm566_vm0  ;;  %717 = vmatpush.msrb.mxu2 %v613_v7 }
 0x277   :  { %v562_v24 = vsub.f32 1.0, %v561_v20  ;;  %v850_v20 = vld [vmem:[#allocation13 + $0x1e0] sm:$0xff] }
 0x278   :  { %718 = vmatpush.msrb.mxu2 %v612_v9 }
 0x279   :  { %v563_v29 = vmul.f32 %v917_v18, %v562_v24  ;;  %v847_v24 = vld [vmem:[#allocation13 + $0x1c8] sm:$0xff] }
 0x27a   :  { %854 = vmatpush.msra.mxu2 %v853_v17 }
 0x27b   :  { %v564_v35 = vadd.f32 %v917_v18, %v563_v29 }
 0x27d   :  { %v568_v41 = vsel %vm567_vm2, %v917_v18, %v564_v35  ;;  %v852_v18 = vld [vmem:[#allocation13 + $0x1f0] sm:$0xff]  ;;  %v843_v35 = vld [vmem:[#allocation13 + $0x1a8] sm:$0xff] }
 0x27e   :  { %v573_v43 = vsel %vm570_vm3, %v572_v38, %v568_v41  ;;  %855 = vmatpush.msra.mxu2 %v852_v18  ;;  %v839_v38 = vld [vmem:[#allocation13 + $0x188] sm:$0xff] }
 0x27f   :  { %v1231_v44 = vmul.f32 %v1227_v40, %v573_v43  ;;  %v814_v40 = vld [vmem:[#allocation11 + $0x1f0] sm:$0xff] }
 0x280   :  { %817 = vmatpush.msra.mxu1 %v814_v40  ;;  %856 = vmatpush.msra.mxu2 %v851_v19 }
 0x281   :  { %607 = vmatmul.f32.vlgmr.msra.gmra.mxu3 %v1231_v44  ;;  %661 = vmatmul.f32.vlgmr.msrb.gmra.mxu0 %v1231_v44 }
 0x282   :  { %818 = vmatpush.msra.mxu1 %v813_v52  ;;  %857 = vmatpush.msra.mxu2 %v850_v20 }
 0x284   :  { %819 = vmatpush.msra.mxu1 %v812_v53  ;;  %858 = vmatpush.msra.mxu2 %v849_v21 }
 0x286   :  { %820 = vmatpush.msra.mxu1 %v811_v54  ;;  %859 = vmatpush.msra.mxu2 %v848_v22 }
 0x288   :  { %821 = vmatpush.msra.mxu1 %v810_v55  ;;  %860 = vmatpush.msra.mxu2 %v847_v24 }
 0x289   :  { %756 = vmatmul.f32.vlgmr.msrb.gmra.mxu3 %v1231_v44 }
 0x28a   :  { %822 = vmatpush.msra.mxu1 %v809_v56  ;;  %861 = vmatpush.msra.mxu2 %v846_v25 }
 0x28c   :  { %823 = vmatpush.msra.mxu1 %v808_v57  ;;  %862 = vmatpush.msra.mxu2 %v845_v27 }
 0x28e   :  { %824 = vmatpush.msra.mxu1 %v807_v59  ;;  %863 = vmatpush.msra.mxu2 %v844_v30 }
 0x290   :  { %825 = vmatpush.msra.mxu1 %v806_v60  ;;  %864 = vmatpush.msra.mxu2 %v843_v35 }
 0x292   :  { %826 = vmatpush.msra.mxu1 %v805_v63  ;;  %865 = vmatpush.msra.mxu2 %v842_v36 }
 0x294   :  { %827 = vmatpush.msra.mxu1 %v804_v3  ;;  %866 = vmatpush.msra.mxu2 %v841_v0 }
 0x296   :  { %828 = vmatpush.msra.mxu1 %v803_v6  ;;  %867 = vmatpush.msra.mxu2 %v840_v37 }
 0x298   :  { %829 = vmatpush.msra.mxu1 %v802_v8  ;;  %868 = vmatpush.msra.mxu2 %v839_v38 }
 0x29a   :  { %830 = vmatpush.msra.mxu1 %v801_v11  ;;  %869 = vmatpush.msra.mxu2 %v838_v39 }
 0x29c   :  { %831 = vmatpush.msra.mxu1 %v800_v13 }
 0x2fe   :  { %v662_v28 = vpop.f32.mrf.mxu0 }
 0x2ff   :  { %v665_v29 = vmul.f32 %v662_v28, %v364_v26 }
 0x301   :  { %699 = vmatmul.f32.vlgmr.msrb.gmra.mxu1 %v665_v29 }
 0x304   :  { %v608_v31 = vpop.f32.mrf.mxu3 }
 0x305   :  { %v611_v32 = vmul.f32 %v608_v31, %v364_v26 }
 0x307   :  { %719 = vmatmul.f32.vlgmr.msrb.gmra.mxu2 %v611_v32 }
 0x309   :  { %832 = vmatmul.f32.vlgmr.msra.gmra.mxu1 %v1231_v44 }
 0x30c   :  { %v757_v34 = vpop.f32.mrf.mxu3 }
 0x30d   :  { %v760_v33 = vmul.f32 %v757_v34, %v364_v26 }
 0x30f   :  { %794 = vmatmul.f32.vlgmr.msra.gmra.mxu0 %v760_v33 }
 0x37e   :  { %v700_v41 = vpop.f32.mrf.mxu1 }
 0x386   :  { %v833_v42 = vpop.f32.mrf.mxu1 }
 0x387   :  { %v836_v43 = vmul.f32 %v833_v42, %v364_v26 }
 0x389   :  { %870 = vmatmul.f32.vlgmr.msra.gmra.mxu2 %v836_v43 }
 0x38a   :  { %v720_v44 = vpop.f32.mrf.mxu2 }
 0x38b   :  { %v721_v45 = vadd.f32 %v720_v44, %v700_v41 }
 0x38c   :  { %v795_v46 = vpop.f32.mrf.mxu0 }
 0x38d   :  { %v798_v47 = vadd.f32 %v795_v46, %v721_v45 }
 0x40c   :  { %v871_v49 = vpop.f32.mrf.mxu2 }
 0x40d   :  { %v874_v50 = vadd.f32 %v871_v49, %v798_v47 }
 0x40f   :  { %v879_v51 = vadd.f32 %v913_v48, %v874_v50 }
 0x411   :  { %880 = vst [vmem:[#allocation14] sm:$0xff] %v879_v51 }
 0x412   :  { %891 = dma.vmem_to_hbm [thread:$0]  %s887_s18, 128, %s889_s20, [#allocation4]  }
 0x413   :  { %1118 = dma.done.wait [#allocation4], 128  }
 0x414   :  { %1119 = vsyncadd [#allocation4], 4294967168 }
 0x415   :  { %896 = vsyncpa [#allocation3], 1 }
 0x416   :  { %897 = vsyncpa [#allocation6], 1 }
 0x417   :  { %898 = vsyncpa [#allocation9], 1 }
 0x418   :  { %899 = vsyncpa [#allocation12], 1 }
 0x419   :  { %900 = vsyncpa [#allocation4], 1 }

</bundles_post_ra>
